<compile_context>
chip_gen: v5e
topology: v5e:2x2
jax: 0.10.0
libtpu: 0.0.40
codegen_flags: <defaults>
</compile_context>

<pallas_src>
import math
from functools import partial

import jax
import jax.numpy as jnp
import numpy as np
from jax.experimental import pallas as pl
from jax.experimental.pallas import tpu as pltpu

BN_EPS = 1e-5
LANE = 128
SUBLANE = 8
MIN_TM = 256      # never shrink the MXU M dimension below this; tile Cout instead


def _round_up(v, m):
    return (v + m - 1) // m * m


def _sublane_multiple(dtype):
    # Second-minor tiling of the dtype: f32 -> 8, bf16 -> 16, int8/fp8 -> 32.
    return max(SUBLANE, 32 // jnp.dtype(dtype).itemsize)


def _vmem_budget_and_limit():
    """Per-generation VMEM sizing (v5e/v6e: 128 MiB physical, v7x: 64 MiB)."""
    try:
        cap = int(pltpu.get_tpu_info().vmem_capacity_bytes)
    except Exception:
        cap = 64 * 1024 * 1024                       # conservative (v7x) fallback
    cap = max(cap, 16 * 1024 * 1024)
    limit = min(int(cap * 0.80), 100 * 1024 * 1024)  # scoped-VMEM limit for Mosaic
    budget = min(int(cap * 0.65), 80 * 1024 * 1024)  # what the tile picker may use
    return budget, limit


# --------------------------------------------------------------------------- #
# Pallas kernels
# --------------------------------------------------------------------------- #
def _gemm_stats_y_kernel(x_ref, w_ref, y_ref, psum_ref, psumsq_ref):
    """Single-GEMM pass: y = X @ W written to HBM + per-tile partial BN stats."""
    y = jnp.dot(x_ref[...], w_ref[...], preferred_element_type=jnp.float32)
    y_ref[...] = y
    psum_ref[...] = jnp.sum(y, axis=0, keepdims=True)[None]
    psumsq_ref[...] = jnp.sum(y * y, axis=0, keepdims=True)[None]


def _gemm_stats_kernel(x_ref, w_ref, psum_ref, psumsq_ref):
    """Recompute strategy pass 1: per-tile partial sum / sum-of-squares only."""
    y = jnp.dot(x_ref[...], w_ref[...], preferred_element_type=jnp.float32)
    psum_ref[...] = jnp.sum(y, axis=0, keepdims=True)[None]
    psumsq_ref[...] = jnp.sum(y * y, axis=0, keepdims=True)[None]


def _bn_relu_kernel(y_ref, scale_ref, shift_ref, o_ref):
    """Elementwise epilogue over stored y: relu(y * scale + shift), in place."""
    o_ref[...] = jnp.maximum(y_ref[...] * scale_ref[...] + shift_ref[...],
                             0.0).astype(o_ref.dtype)


def _gemm_bn_relu_kernel(x_ref, w_ref, scale_ref, shift_ref, o_ref):
    """Recompute strategy pass 2: y = X @ W with fused single-FMA BN + ReLU."""
    y = jnp.dot(x_ref[...], w_ref[...], preferred_element_type=jnp.float32)
    o_ref[...] = jnp.maximum(y * scale_ref[...] + shift_ref[...],
                             0.0).astype(o_ref.dtype)


# --------------------------------------------------------------------------- #
# Host-side helpers
# --------------------------------------------------------------------------- #
def _im2col_nchw(x, kh, kw, stride, padding):
    """im2col with (c, kh, kw) column order — matches weight.reshape(Cout, -1)."""
    N, C, H, W = x.shape
    Ho = (H + 2 * padding - kh) // stride + 1
    Wo = (W + 2 * padding - kw) // stride + 1
    xp = x if padding == 0 else jnp.pad(
        x, ((0, 0), (0, 0), (padding, padding), (padding, padding)))
    if kh == 1 and kw == 1:
        cols = xp[:, :, 0:stride * (Ho - 1) + 1:stride, 0:stride * (Wo - 1) + 1:stride]
        patches = cols.transpose(0, 2, 3, 1).reshape(N * Ho * Wo, C)
        return patches, Ho, Wo
    # TODO(synk): in-kernel tap accumulation (halo DMA) instead of materializing
    # a kh*kw x larger patches array in HBM.
    cols = []
    for i in range(kh):
        for j in range(kw):
            cols.append(xp[:, :, i:i + stride * Ho:stride, j:j + stride * Wo:stride])
    cols = jnp.stack(cols, axis=2)                 # (N, C, kh*kw, Ho, Wo)
    cols = cols.reshape(N, C * kh * kw, Ho, Wo)    # channel-major, then (kh, kw)
    patches = cols.transpose(0, 2, 3, 1).reshape(N * Ho * Wo, C * kh * kw)
    return patches, Ho, Wo


def _pick_tiles(M, Kpad, Cpad, cbytes, budget):
    """Pick (tm, tn). Prefers large tm (amortizes per-step overhead), keeps
    tm >= MIN_TM by tiling Cout when the weight block is large, and only shrinks
    tm below MIN_TM as a last resort."""
    tn_cands = [t for t in range(Cpad, 0, -LANE) if Cpad % t == 0]  # divisors of Cpad
    tm = _round_up(min(1024, max(M, SUBLANE)), SUBLANE)
    tn = tn_cands[0]

    def fits(tm_, tn_):
        gemm = (2 * tm_ * Kpad * cbytes        # X tile (double-buffered)
                + 2 * Kpad * tn_ * cbytes      # weight tile (double-buffered)
                + 2 * tm_ * tn_ * 4            # f32 y / out tile (double-buffered)
                + 8 * tn_ * 4)                 # per-tile stat partial blocks
        elem = 4 * tm_ * tn_ * 4               # elementwise BN pass (y in + out)
        return max(gemm, elem) <= budget

    while not fits(tm, tn) and tm > MIN_TM:
        tm = max(MIN_TM, _round_up(tm // 2, SUBLANE))
    i = 0
    while not fits(tm, tn) and i + 1 < len(tn_cands):
        i += 1
        tn = tn_cands[i]
    while not fits(tm, tn) and tm > SUBLANE:   # last resort only
        tm = max(SUBLANE, _round_up(tm // 2, SUBLANE))
    return tm, tn


@partial(jax.jit, static_argnames=("stride", "padding", "mxu_dtype", "single_pass"))
def conv_bn_relu(x, weight, gamma, beta, stride=1, padding=0,
                 mxu_dtype=jnp.bfloat16, single_pass=None):
    """x: (N, Cin, H, W), weight: (Cout, Cin, kh, kw) -> (N, Cout, Ho, Wo).

    mxu_dtype:   GEMM operand dtype (bf16 default: bf16-native MXU on v5e/v6e/
                 v7x; accumulation, stats and the epilogue stay f32).  Use
                 jnp.float32 for exact f32 parity.
    single_pass: None -> auto; True -> single GEMM + stored y + elementwise
                 BN/ReLU; False -> recompute the GEMM in pass 2.
    """
    Cout, Cin, kh, kw = weight.shape
    N = x.shape[0]
    compute_dtype = jnp.dtype(mxu_dtype)
    cbytes = compute_dtype.itemsize

    # Cast before im2col so the (possibly kh*kw-inflated) patches live in HBM at
    # the compute dtype (halves the intermediate for bf16).
    patches, Ho, Wo = _im2col_nchw(x.astype(compute_dtype), kh, kw, stride, padding)
    M, K = patches.shape

    Kpad = _round_up(K, _sublane_multiple(compute_dtype))
    Cpad = _round_up(Cout, LANE)              # lane-dense output stores
    budget, vmem_limit = _vmem_budget_and_limit()
    tm, tn = _pick_tiles(M, Kpad, Cpad, cbytes, budget)
    M_pad = _round_up(M, tm)
    num_m, num_n = M_pad // tm, Cpad // tn

    if single_pass is None:
        # Recompute the GEMM only when a second streaming read of X is clearly
        # cheaper than writing + re-reading an f32 y intermediate (and the
        # duplicated MXU work stays small), i.e. Kpad << Cpad.
        single_pass = Kpad * cbytes > Cpad * 4

    # Zero-padded GEMM operands; zero rows/cols are exact no-ops for conv + stats.
    if (M_pad, Kpad) == (M, K):
        xp = patches
    else:
        xp = jnp.zeros((M_pad, Kpad), compute_dtype).at[:M, :K].set(patches)
    w2d = weight.reshape(Cout, K).T.astype(compute_dtype)          # (K, Cout)
    if (Kpad, Cpad) == (K, Cout):
        wp = w2d
    else:
        wp = jnp.zeros((Kpad, Cpad), compute_dtype).at[:K, :Cout].set(w2d)

    cparams = pltpu.CompilerParams(
        dimension_semantics=("parallel", "parallel"),   # megacore-splittable
        vmem_limit_bytes=vmem_limit)
    stat_shape = jax.ShapeDtypeStruct((num_m, 1, Cpad), jnp.float32)
    stat_spec = pl.BlockSpec((1, 1, tn), lambda i, j: (i, 0, j))
    x_spec = pl.BlockSpec((tm, Kpad), lambda i, j: (i, 0))
    w_spec = pl.BlockSpec((Kpad, tn), lambda i, j: (0, j))
    vec_spec = pl.BlockSpec((1, tn), lambda i, j: (0, j))
    y_spec = pl.BlockSpec((tm, tn), lambda i, j: (i, j))

    # ------------- pass 1: GEMM (+ y) and per-tile partial statistics -------- #
    if single_pass:
        y2d, psum, psumsq = pl.pallas_call(
            _gemm_stats_y_kernel,
            out_shape=(jax.ShapeDtypeStruct((M_pad, Cpad), jnp.float32),
                       stat_shape, stat_shape),
            grid=(num_m, num_n),
            in_specs=[x_spec, w_spec],
            out_specs=(y_spec, stat_spec, stat_spec),
            compiler_params=cparams,
        )(xp, wp)
    else:
        psum, psumsq = pl.pallas_call(
            _gemm_stats_kernel,
            out_shape=(stat_shape, stat_shape),
            grid=(num_m, num_n),
            in_specs=[x_spec, w_spec],
            out_specs=(stat_spec, stat_spec),
            compiler_params=cparams,
        )(xp, wp)

    # Host-side reduction of the per-tile partials (better cancellation than a
    # single running accumulator), then fold BN into one FMA:
    #   scale = gamma * rsqrt(var + eps),  shift = beta - mean * scale.
    sum_c = jnp.sum(psum, axis=0)             # (1, Cpad)
    sumsq_c = jnp.sum(psumsq, axis=0)
    inv_m = jnp.float32(1.0 / M)              # true M: padded rows contribute 0
    mean = sum_c * inv_m
    var = jnp.maximum(sumsq_c * inv_m - mean * mean, 0.0)    # biased variance
    g = jnp.zeros((1, Cpad), jnp.float32).at[:, :Cout].set(
        gamma.reshape(1, Cout).astype(jnp.float32))
    b = jnp.zeros((1, Cpad), jnp.float32).at[:, :Cout].set(
        beta.reshape(1, Cout).astype(jnp.float32))
    scale = g * jax.lax.rsqrt(var + BN_EPS)
    shift = b - mean * scale

    # ------------------------ pass 2: BN + ReLU epilogue ---------------------- #
    if single_pass:
        out2d = pl.pallas_call(
            _bn_relu_kernel,
            out_shape=jax.ShapeDtypeStruct((M_pad, Cpad), jnp.float32),
            grid=(num_m, num_n),
            in_specs=[y_spec, vec_spec, vec_spec],
            out_specs=y_spec,
            input_output_aliases={0: 0},       # rewrite the y buffer in place
            compiler_params=cparams,
        )(y2d, scale, shift)
    else:
        out2d = pl.pallas_call(
            _gemm_bn_relu_kernel,
            out_shape=jax.ShapeDtypeStruct((M_pad, Cpad), jnp.float32),
            grid=(num_m, num_n),
            in_specs=[x_spec, w_spec, vec_spec, vec_spec],
            out_specs=y_spec,
            compiler_params=cparams,
        )(xp, wp, scale, shift)

    # NCHW to match the PyTorch module's output layout.
    # TODO(synk): emit natively in NCHW to drop this extra HBM round trip.
    out = out2d[:M, :Cout].reshape(N, Ho, Wo, Cout).transpose(0, 3, 1, 2)
    return out.astype(x.dtype)


def init_params(key, in_planes, out_planes, kernel_size=1):
    """Deterministic init matching the PyTorch module's __init__."""
    n = kernel_size * kernel_size * out_planes
    std = math.sqrt(2.0 / n)
    weight = std * jax.random.normal(
        key, (out_planes, in_planes, kernel_size, kernel_size), dtype=jnp.float32)
    gamma = jnp.ones((out_planes,), dtype=jnp.float32)   # bn.weight.fill_(1)
    beta = jnp.zeros((out_planes,), dtype=jnp.float32)   # bn.bias.zero_()
    return weight, gamma, beta


def _reference(x, weight, gamma, beta, stride=1, padding=0):
    """Pure-JAX f32 reference for correctness checking."""
    y = jax.lax.conv_general_dilated(
        x, weight, window_strides=(stride, stride),
        padding=[(padding, padding), (padding, padding)],
        dimension_numbers=("NCHW", "OIHW", "NCHW"))
    mean = jnp.mean(y, axis=(0, 2, 3), keepdims=True)
    var = jnp.mean(jnp.square(y - mean), axis=(0, 2, 3), keepdims=True)
    y_hat = (y - mean) * jax.lax.rsqrt(var + BN_EPS)
    out = y_hat * gamma.reshape(1, -1, 1, 1) + beta.reshape(1, -1, 1, 1)
    return jnp.maximum(out, 0.0)


if __name__ == "__main__":
    in_planes, out_planes = 4, 8
    key = jax.random.PRNGKey(0)
    kx, kw1, kw3 = jax.random.split(key, 3)
    x = jax.random.normal(kx, (2, in_planes, 16, 16), dtype=jnp.float32)

    w1, g1, b1 = init_params(kw1, in_planes, out_planes, kernel_size=1)
    w3, g3, b3 = init_params(kw3, in_planes, out_planes, kernel_size=3)

    # 1x1 conv (module defaults): f32 MXU path, auto strategy (recompute GEMM).
    ref1 = jax.block_until_ready(_reference(x, w1, g1, b1, stride=1, padding=0))
    out1 = jax.block_until_ready(
        conv_bn_relu(x, w1, g1, b1, stride=1, padding=0, mxu_dtype=jnp.float32))
    np.testing.assert_allclose(np.asarray(out1), np.asarray(ref1), atol=1e-4, rtol=1e-4)

    # 1x1 conv: default bf16 MXU path, forced single-GEMM (y + fused stats) path.
    out1b = jax.block_until_ready(
        conv_bn_relu(x, w1, g1, b1, stride=1, padding=0, single_pass=True))
    np.testing.assert_allclose(np.asarray(out1b), np.asarray(ref1), atol=5e-2, rtol=5e-2)

    # 3x3 conv, padding=1: f32 single-GEMM path (exact parity check).
    ref3 = jax.block_until_ready(_reference(x, w3, g3, b3, stride=1, padding=1))
    out3 = jax.block_until_ready(
        conv_bn_relu(x, w3, g3, b3, stride=1, padding=1,
                     mxu_dtype=jnp.float32, single_pass=True))
    np.testing.assert_allclose(np.asarray(out3), np.asarray(ref3), atol=1e-4, rtol=1e-4)

    # 3x3 conv, padding=1: default bf16 MXU path, auto strategy.
    out3b = jax.block_until_ready(
        conv_bn_relu(x, w3, g3, b3, stride=1, padding=1))
    np.testing.assert_allclose(np.asarray(out3b), np.asarray(ref3), atol=5e-2, rtol=5e-2)

    print("KERNEL_OK")
</pallas_src>

<mosaic_0001>
module attributes {stable_mosaic.version = 11 : i64} {
  func.func @_gemm_stats_kernel(%arg0: i32, %arg1: i32, %arg2: memref<512x8xf32, #tpu.memory_space<vmem>>, %arg3: memref<8x128xf32, #tpu.memory_space<vmem>>, %arg4: memref<1x1x128xf32, #tpu.memory_space<vmem>>, %arg5: memref<1x1x128xf32, #tpu.memory_space<vmem>>) attributes {dimension_semantics = [#tpu.dimension_semantics<parallel>, #tpu.dimension_semantics<parallel>], iteration_bounds = array<i64: 1, 1>, scalar_prefetch = 0 : i64, scratch_operands = 0 : i64, tpu.core_type = #tpu.core_type<tc>, window_params = [{transform_indices = @transform_0, window_bounds = array<i64: 512, 8>}, {transform_indices = @transform_1, window_bounds = array<i64: 8, 128>}, {transform_indices = @transform_2, window_bounds = array<i64: 1, 1, 128>}, {transform_indices = @transform_3, window_bounds = array<i64: 1, 1, 128>}]} {
    %c0 = arith.constant 0 : index
    %c0_0 = arith.constant 0 : index
    %0 = vector.load %arg2[%c0, %c0_0] : memref<512x8xf32, #tpu.memory_space<vmem>>, vector<512x8xf32>
    %c0_1 = arith.constant 0 : index
    %c0_2 = arith.constant 0 : index
    %1 = vector.load %arg3[%c0_1, %c0_2] : memref<8x128xf32, #tpu.memory_space<vmem>>, vector<8x128xf32>
    %cst = arith.constant dense<0.000000e+00> : vector<512x128xf32>
    %2 = tpu.matmul %0, %1, %cst {dimension_numbers = #tpu.dot_dimension_numbers<[1], [0], [0], [1], [0, 0, 1, 1], [], []>} : vector<512x8xf32>, vector<8x128xf32>, vector<512x128xf32> -> vector<512x128xf32>
    %cst_3 = arith.constant dense<0.000000e+00> : vector<128xf32>
    %3 = vector.multi_reduction <add>, %2, %cst_3 [0] : vector<512x128xf32> to vector<128xf32>
    %4 = vector.shape_cast %3 : vector<128xf32> to vector<1x128xf32>
    %5 = vector.shape_cast %4 : vector<1x128xf32> to vector<1x1x128xf32>
    %c0_4 = arith.constant 0 : index
    %c0_5 = arith.constant 0 : index
    %c0_6 = arith.constant 0 : index
    %6 = vector.load %arg4[%c0_4, %c0_5, %c0_6] : memref<1x1x128xf32, #tpu.memory_space<vmem>>, vector<1x1x128xf32>
    tpu.vector_store %arg4[%c0_4, %c0_5, %c0_6], %5 {strides = array<i32>} : memref<1x1x128xf32, #tpu.memory_space<vmem>>, vector<1x1x128xf32>,
    %7 = arith.mulf %2, %2 : vector<512x128xf32>
    %cst_7 = arith.constant dense<0.000000e+00> : vector<128xf32>
    %8 = vector.multi_reduction <add>, %7, %cst_7 [0] : vector<512x128xf32> to vector<128xf32>
    %9 = vector.shape_cast %8 : vector<128xf32> to vector<1x128xf32>
    %10 = vector.shape_cast %9 : vector<1x128xf32> to vector<1x1x128xf32>
    %c0_8 = arith.constant 0 : index
    %c0_9 = arith.constant 0 : index
    %c0_10 = arith.constant 0 : index
    %11 = vector.load %arg5[%c0_8, %c0_9, %c0_10] : memref<1x1x128xf32, #tpu.memory_space<vmem>>, vector<1x1x128xf32>
    tpu.vector_store %arg5[%c0_8, %c0_9, %c0_10], %10 {strides = array<i32>} : memref<1x1x128xf32, #tpu.memory_space<vmem>>, vector<1x1x128xf32>,
    return
  }
  func.func @transform_0(%arg0: i32, %arg1: i32) -> (i32, i32) {
    %c0_i32 = arith.constant 0 : i32
    %c0_i32_0 = arith.constant 0 : i32
    return %arg0, %c0_i32 : i32, i32
  }
  func.func @transform_1(%arg0: i32, %arg1: i32) -> (i32, i32) {
    %c0_i32 = arith.constant 0 : i32
    %c0_i32_0 = arith.constant 0 : i32
    return %c0_i32, %arg1 : i32, i32
  }
  func.func @transform_2(%arg0: i32, %arg1: i32) -> (i32, i32, i32) {
    %c0_i32 = arith.constant 0 : i32
    %c0_i32_0 = arith.constant 0 : i32
    return %arg0, %c0_i32, %arg1 : i32, i32, i32
  }
  func.func @transform_3(%arg0: i32, %arg1: i32) -> (i32, i32, i32) {
    %c0_i32 = arith.constant 0 : i32
    %c0_i32_0 = arith.constant 0 : i32
    return %arg0, %c0_i32, %arg1 : i32, i32, i32
  }
}

module attributes {stable_mosaic.version = 11 : i64} {
  func.func @_gemm_bn_relu_kernel(%arg0: i32, %arg1: i32, %arg2: memref<512x8xf32, #tpu.memory_space<vmem>>, %arg3: memref<8x128xf32, #tpu.memory_space<vmem>>, %arg4: memref<1x128xf32, #tpu.memory_space<vmem>>, %arg5: memref<1x128xf32, #tpu.memory_space<vmem>>, %arg6: memref<512x128xf32, #tpu.memory_space<vmem>>) attributes {dimension_semantics = [#tpu.dimension_semantics<parallel>, #tpu.dimension_semantics<parallel>], iteration_bounds = array<i64: 1, 1>, scalar_prefetch = 0 : i64, scratch_operands = 0 : i64, tpu.core_type = #tpu.core_type<tc>, window_params = [{transform_indices = @transform_0, window_bounds = array<i64: 512, 8>}, {transform_indices = @transform_1, window_bounds = array<i64: 8, 128>}, {transform_indices = @transform_2, window_bounds = array<i64: 1, 128>}, {transform_indices = @transform_3, window_bounds = array<i64: 1, 128>}, {transform_indices = @transform_4, window_bounds = array<i64: 512, 128>}]} {
    %c0 = arith.constant 0 : index
    %c0_0 = arith.constant 0 : index
    %0 = vector.load %arg2[%c0, %c0_0] : memref<512x8xf32, #tpu.memory_space<vmem>>, vector<512x8xf32>
    %c0_1 = arith.constant 0 : index
    %c0_2 = arith.constant 0 : index
    %1 = vector.load %arg3[%c0_1, %c0_2] : memref<8x128xf32, #tpu.memory_space<vmem>>, vector<8x128xf32>
    %cst = arith.constant dense<0.000000e+00> : vector<512x128xf32>
    %2 = tpu.matmul %0, %1, %cst {dimension_numbers = #tpu.dot_dimension_numbers<[1], [0], [0], [1], [0, 0, 1, 1], [], []>} : vector<512x8xf32>, vector<8x128xf32>, vector<512x128xf32> -> vector<512x128xf32>
    %c0_3 = arith.constant 0 : index
    %c0_4 = arith.constant 0 : index
    %3 = vector.load %arg4[%c0_3, %c0_4] : memref<1x128xf32, #tpu.memory_space<vmem>>, vector<1x128xf32>
    %4 = vector.broadcast %3 : vector<1x128xf32> to vector<512x128xf32>
    %5 = arith.mulf %2, %4 : vector<512x128xf32>
    %c0_5 = arith.constant 0 : index
    %c0_6 = arith.constant 0 : index
    %6 = vector.load %arg5[%c0_5, %c0_6] : memref<1x128xf32, #tpu.memory_space<vmem>>, vector<1x128xf32>
    %7 = vector.broadcast %6 : vector<1x128xf32> to vector<512x128xf32>
    %8 = arith.addf %5, %7 : vector<512x128xf32>
    %cst_7 = arith.constant 0.000000e+00 : f32
    %9 = vector.broadcast %cst_7 : f32 to vector<512x128xf32>
    %10 = arith.maximumf %8, %9 : vector<512x128xf32>
    %c0_8 = arith.constant 0 : index
    %c0_9 = arith.constant 0 : index
    %11 = vector.load %arg6[%c0_8, %c0_9] : memref<512x128xf32, #tpu.memory_space<vmem>>, vector<512x128xf32>
    tpu.vector_store %arg6[%c0_8, %c0_9], %10 {strides = array<i32>} : memref<512x128xf32, #tpu.memory_space<vmem>>, vector<512x128xf32>,
    return
  }
  func.func @transform_0(%arg0: i32, %arg1: i32) -> (i32, i32) {
    %c0_i32 = arith.constant 0 : i32
    %c0_i32_0 = arith.constant 0 : i32
    return %arg0, %c0_i32 : i32, i32
  }
  func.func @transform_1(%arg0: i32, %arg1: i32) -> (i32, i32) {
    %c0_i32 = arith.constant 0 : i32
    %c0_i32_0 = arith.constant 0 : i32
    return %c0_i32, %arg1 : i32, i32
  }
  func.func @transform_2(%arg0: i32, %arg1: i32) -> (i32, i32) {
    %c0_i32 = arith.constant 0 : i32
    %c0_i32_0 = arith.constant 0 : i32
    return %c0_i32, %arg1 : i32, i32
  }
  func.func @transform_3(%arg0: i32, %arg1: i32) -> (i32, i32) {
    %c0_i32 = arith.constant 0 : i32
    %c0_i32_0 = arith.constant 0 : i32
    return %c0_i32, %arg1 : i32, i32
  }
  func.func @transform_4(%arg0: i32, %arg1: i32) -> (i32, i32) {
    %c0_i32 = arith.constant 0 : i32
    return %arg0, %arg1 : i32, i32
  }
}

</mosaic_0001>

<bundles_post_ra>
// kernel: conv_bn_relu.3
= control target key start
LH: loop header
LB: loop body
LE: loop exit
PB: predicated region body
PF: predicated region fallthrough
CT: control target
= control target key end

     0   :  { %vm82_vm0 = vcmask 64512   ;;  %s1435_s1 = inlined_call_operand.vmem [shape: f32[8,128], index: 1, kind: input, shape index: {}]   ;;  %s1436_s0 = inlined_call_operand.vmem [shape: f32[512,8], index: 0, kind: input, shape index: {}]   ;;  %s1437_s2 = inlined_call_operand.vmem [shape: f32[1,128], index: 2, kind: input, shape index: {}]   ;;  %s1438_s3 = inlined_call_operand.vmem [shape: f32[1,128], index: 3, kind: input, shape index: {}]   ;;  %s1439_s4 = inlined_call_operand.vmem [shape: f32[512,128], index: 4, kind: output, shape index: {}]  }
   0x1   :  { %v81_v0 = vld [vmem:[%s1435_s1] sm:$0xff]  ;;  %v50_v5 = vld [vmem:[%s1436_s0 + $0x108] sm:$0xff]  ;;  %v51_v9 = vld [vmem:[%s1436_s0 + $0x110] sm:$0xff] }
   0x2   :  { %v49_v1 = vld [vmem:[%s1436_s0 + $0x100] sm:$0xff]  ;;  %817 = vmatpush.msra.mxu2 %v81_v0  ;;  %818 = vmatpush.msra.mxu3 %v81_v0  ;;  %v66_v6 = vld [vmem:[%s1436_s0 + $0x188] sm:$0xff]  ;;  %v67_v10 = vld [vmem:[%s1436_s0 + $0x190] sm:$0xff] }
   0x3   :  { %v65_v2 = vld [vmem:[%s1436_s0 + $0x180] sm:$0xff]  ;;  %784 = vmatmul.msk.f32.vlgmr.msra.gmra.mxu2 %vm82_vm0, %v49_v1  ;;  %290 = vmatpush.msra.mxu0 %v81_v0  ;;  %v18_v7 = vld [vmem:[%s1436_s0 + $0x8] sm:$0xff]  ;;  %v19_v11 = vld [vmem:[%s1436_s0 + $0x10] sm:$0xff] }
   0x4   :  { %v17_v3 = vld [vmem:[%s1436_s0] sm:$0xff]  ;;  %800 = vmatmul.msk.f32.vlgmr.msra.gmra.mxu3 %vm82_vm0, %v65_v2  ;;  %816 = vmatpush.msra.mxu1 %v81_v0  ;;  %v34_v8 = vld [vmem:[%s1436_s0 + $0x88] sm:$0xff]  ;;  %v35_v12 = vld [vmem:[%s1436_s0 + $0x90] sm:$0xff] }
   0x5   :  { %v33_v4 = vld [vmem:[%s1436_s0 + $0x80] sm:$0xff]  ;;  %752 = vmatmul.msk.f32.vlgmr.msra.gmra.mxu0 %vm82_vm0, %v17_v3  ;;  %v52_v13 = vld [vmem:[%s1436_s0 + $0x118] sm:$0xff]  ;;  %v54_v21 = vld [vmem:[%s1436_s0 + $0x128] sm:$0xff] }
   0x6   :  { %768 = vmatmul.msk.f32.vlgmr.msra.gmra.mxu1 %vm82_vm0, %v33_v4  ;;  %v68_v14 = vld [vmem:[%s1436_s0 + $0x198] sm:$0xff]  ;;  %v53_v17 = vld [vmem:[%s1436_s0 + $0x120] sm:$0xff]  ;;  %v70_v22 = vld [vmem:[%s1436_s0 + $0x1a8] sm:$0xff] }
   0x7   :  { %v20_v15 = vld [vmem:[%s1436_s0 + $0x18] sm:$0xff]  ;;  %v69_v18 = vld [vmem:[%s1436_s0 + $0x1a0] sm:$0xff]  ;;  %v22_v23 = vld [vmem:[%s1436_s0 + $0x28] sm:$0xff] }
   0x8   :  { %v36_v16 = vld [vmem:[%s1436_s0 + $0x98] sm:$0xff]  ;;  %v21_v19 = vld [vmem:[%s1436_s0 + $0x20] sm:$0xff]  ;;  %v38_v24 = vld [vmem:[%s1436_s0 + $0xa8] sm:$0xff] }
   0x9   :  { %v37_v20 = vld [vmem:[%s1436_s0 + $0xa0] sm:$0xff]  ;;  %v55_v25 = vld [vmem:[%s1436_s0 + $0x130] sm:$0xff]  ;;  %v56_v29 = vld [vmem:[%s1436_s0 + $0x138] sm:$0xff] }
   0xa   :  { %v71_v26 = vld [vmem:[%s1436_s0 + $0x1b0] sm:$0xff]  ;;  %v72_v30 = vld [vmem:[%s1436_s0 + $0x1b8] sm:$0xff]  ;;  %v57_v33 = vld [vmem:[%s1436_s0 + $0x140] sm:$0xff] }
   0xb   :  { %785 = vmatmul.msk.f32.gmra.mxu2 %vm82_vm0, %v50_v5  ;;  %v23_v27 = vld [vmem:[%s1436_s0 + $0x30] sm:$0xff]  ;;  %v24_v31 = vld [vmem:[%s1436_s0 + $0x38] sm:$0xff]  ;;  %v73_v34 = vld [vmem:[%s1436_s0 + $0x1c0] sm:$0xff] }
   0xc   :  { %801 = vmatmul.msk.f32.gmra.mxu3 %vm82_vm0, %v66_v6  ;;  %v39_v28 = vld [vmem:[%s1436_s0 + $0xb0] sm:$0xff]  ;;  %v40_v32 = vld [vmem:[%s1436_s0 + $0xb8] sm:$0xff]  ;;  %v25_v35 = vld [vmem:[%s1436_s0 + $0x40] sm:$0xff] }
   0xd   :  { %753 = vmatmul.msk.f32.gmra.mxu0 %vm82_vm0, %v18_v7  ;;  %v41_v36 = vld [vmem:[%s1436_s0 + $0xc0] sm:$0xff]  ;;  %v58_v37 = vld [vmem:[%s1436_s0 + $0x148] sm:$0xff]  ;;  %v59_v41 = vld [vmem:[%s1436_s0 + $0x150] sm:$0xff] }
   0xe   :  { %769 = vmatmul.msk.f32.gmra.mxu1 %vm82_vm0, %v34_v8  ;;  %v74_v38 = vld [vmem:[%s1436_s0 + $0x1c8] sm:$0xff]  ;;  %v75_v42 = vld [vmem:[%s1436_s0 + $0x1d0] sm:$0xff]  ;;  %v60_v45 = vld [vmem:[%s1436_s0 + $0x158] sm:$0xff] }
   0xf   :  { %v26_v39 = vld [vmem:[%s1436_s0 + $0x48] sm:$0xff]  ;;  %v27_v43 = vld [vmem:[%s1436_s0 + $0x50] sm:$0xff]  ;;  %v76_v46 = vld [vmem:[%s1436_s0 + $0x1d8] sm:$0xff] }
  0x10   :  { %v42_v40 = vld [vmem:[%s1436_s0 + $0xc8] sm:$0xff]  ;;  %v43_v44 = vld [vmem:[%s1436_s0 + $0xd0] sm:$0xff]  ;;  %v28_v47 = vld [vmem:[%s1436_s0 + $0x58] sm:$0xff] }
  0x11   :  { %v44_v48 = vld [vmem:[%s1436_s0 + $0xd8] sm:$0xff]  ;;  %v61_v49 = vld [vmem:[%s1436_s0 + $0x160] sm:$0xff]  ;;  %v62_v53 = vld [vmem:[%s1436_s0 + $0x168] sm:$0xff] }
  0x12   :  { %v77_v50 = vld [vmem:[%s1436_s0 + $0x1e0] sm:$0xff]  ;;  %v78_v54 = vld [vmem:[%s1436_s0 + $0x1e8] sm:$0xff]  ;;  %v63_v57 = vld [vmem:[%s1436_s0 + $0x170] sm:$0xff] }
  0x13   :  { %786 = vmatmul.msk.f32.gmra.mxu2 %vm82_vm0, %v51_v9  ;;  %v29_v51 = vld [vmem:[%s1436_s0 + $0x60] sm:$0xff]  ;;  %v30_v55 = vld [vmem:[%s1436_s0 + $0x68] sm:$0xff]  ;;  %v79_v58 = vld [vmem:[%s1436_s0 + $0x1f0] sm:$0xff] }
  0x14   :  { %802 = vmatmul.msk.f32.gmra.mxu3 %vm82_vm0, %v67_v10  ;;  %v45_v52 = vld [vmem:[%s1436_s0 + $0xe0] sm:$0xff]  ;;  %v46_v56 = vld [vmem:[%s1436_s0 + $0xe8] sm:$0xff]  ;;  %v31_v59 = vld [vmem:[%s1436_s0 + $0x70] sm:$0xff] }
  0x15   :  { %754 = vmatmul.msk.f32.gmra.mxu0 %vm82_vm0, %v19_v11  ;;  %v47_v60 = vld [vmem:[%s1436_s0 + $0xf0] sm:$0xff]  ;;  %v64_v61 = vld [vmem:[%s1436_s0 + $0x178] sm:$0xff]  ;;  %v1108_v1 = vld [vmem:[%s1437_s2] ss:$0 sm:$0xff] }
  0x16   :  { %770 = vmatmul.msk.f32.gmra.mxu1 %vm82_vm0, %v35_v12  ;;  %v80_v62 = vld [vmem:[%s1436_s0 + $0x1f8] sm:$0xff]  ;;  %v1113_v2 = vld [vmem:[%s1438_s3] ss:$0 sm:$0xff] }
  0x17   :  { %v32_v63 = vld [vmem:[%s1436_s0 + $0x78] sm:$0xff] }
  0x18   :  { %v48_v0 = vld [vmem:[%s1436_s0 + $0xf8] sm:$0xff] }
  0x1b   :  { %787 = vmatmul.msk.f32.gmra.mxu2 %vm82_vm0, %v52_v13 }
  0x1c   :  { %803 = vmatmul.msk.f32.gmra.mxu3 %vm82_vm0, %v68_v14 }
  0x1d   :  { %755 = vmatmul.msk.f32.gmra.mxu0 %vm82_vm0, %v20_v15 }
  0x1e   :  { %771 = vmatmul.msk.f32.gmra.mxu1 %vm82_vm0, %v36_v16 }
  0x23   :  { %788 = vmatmul.msk.f32.gmra.mxu2 %vm82_vm0, %v53_v17 }
  0x24   :  { %804 = vmatmul.msk.f32.gmra.mxu3 %vm82_vm0, %v69_v18 }
  0x25   :  { %756 = vmatmul.msk.f32.gmra.mxu0 %vm82_vm0, %v21_v19 }
  0x26   :  { %772 = vmatmul.msk.f32.gmra.mxu1 %vm82_vm0, %v37_v20 }
  0x2b   :  { %789 = vmatmul.msk.f32.gmra.mxu2 %vm82_vm0, %v54_v21 }
  0x2c   :  { %805 = vmatmul.msk.f32.gmra.mxu3 %vm82_vm0, %v70_v22 }
  0x2d   :  { %757 = vmatmul.msk.f32.gmra.mxu0 %vm82_vm0, %v22_v23 }
  0x2e   :  { %773 = vmatmul.msk.f32.gmra.mxu1 %vm82_vm0, %v38_v24 }
  0x33   :  { %790 = vmatmul.msk.f32.gmra.mxu2 %vm82_vm0, %v55_v25 }
  0x34   :  { %806 = vmatmul.msk.f32.gmra.mxu3 %vm82_vm0, %v71_v26 }
  0x35   :  { %758 = vmatmul.msk.f32.gmra.mxu0 %vm82_vm0, %v23_v27 }
  0x36   :  { %774 = vmatmul.msk.f32.gmra.mxu1 %vm82_vm0, %v39_v28 }
  0x3b   :  { %791 = vmatmul.msk.f32.gmra.mxu2 %vm82_vm0, %v56_v29 }
  0x3c   :  { %807 = vmatmul.msk.f32.gmra.mxu3 %vm82_vm0, %v72_v30 }
  0x3d   :  { %759 = vmatmul.msk.f32.gmra.mxu0 %vm82_vm0, %v24_v31 }
  0x3e   :  { %775 = vmatmul.msk.f32.gmra.mxu1 %vm82_vm0, %v40_v32 }
  0x43   :  { %792 = vmatmul.msk.f32.gmra.mxu2 %vm82_vm0, %v57_v33 }
  0x44   :  { %808 = vmatmul.msk.f32.gmra.mxu3 %vm82_vm0, %v73_v34 }
  0x45   :  { %760 = vmatmul.msk.f32.gmra.mxu0 %vm82_vm0, %v25_v35 }
  0x46   :  { %776 = vmatmul.msk.f32.gmra.mxu1 %vm82_vm0, %v41_v36 }
  0x4b   :  { %793 = vmatmul.msk.f32.gmra.mxu2 %vm82_vm0, %v58_v37 }
  0x4c   :  { %809 = vmatmul.msk.f32.gmra.mxu3 %vm82_vm0, %v74_v38 }
  0x4d   :  { %761 = vmatmul.msk.f32.gmra.mxu0 %vm82_vm0, %v26_v39 }
  0x4e   :  { %777 = vmatmul.msk.f32.gmra.mxu1 %vm82_vm0, %v42_v40 }
  0x53   :  { %794 = vmatmul.msk.f32.gmra.mxu2 %vm82_vm0, %v59_v41 }
  0x54   :  { %810 = vmatmul.msk.f32.gmra.mxu3 %vm82_vm0, %v75_v42 }
  0x55   :  { %762 = vmatmul.msk.f32.gmra.mxu0 %vm82_vm0, %v27_v43 }
  0x56   :  { %778 = vmatmul.msk.f32.gmra.mxu1 %vm82_vm0, %v43_v44 }
  0x5b   :  { %795 = vmatmul.msk.f32.gmra.mxu2 %vm82_vm0, %v60_v45 }
  0x5c   :  { %811 = vmatmul.msk.f32.gmra.mxu3 %vm82_vm0, %v76_v46 }
  0x5d   :  { %763 = vmatmul.msk.f32.gmra.mxu0 %vm82_vm0, %v28_v47 }
  0x5e   :  { %779 = vmatmul.msk.f32.gmra.mxu1 %vm82_vm0, %v44_v48 }
  0x63   :  { %796 = vmatmul.msk.f32.gmra.mxu2 %vm82_vm0, %v61_v49 }
  0x64   :  { %812 = vmatmul.msk.f32.gmra.mxu3 %vm82_vm0, %v77_v50 }
  0x65   :  { %764 = vmatmul.msk.f32.gmra.mxu0 %vm82_vm0, %v29_v51 }
  0x66   :  { %780 = vmatmul.msk.f32.gmra.mxu1 %vm82_vm0, %v45_v52 }
  0x6b   :  { %797 = vmatmul.msk.f32.gmra.mxu2 %vm82_vm0, %v62_v53 }
  0x6c   :  { %813 = vmatmul.msk.f32.gmra.mxu3 %vm82_vm0, %v78_v54 }
  0x6d   :  { %765 = vmatmul.msk.f32.gmra.mxu0 %vm82_vm0, %v30_v55 }
  0x6e   :  { %781 = vmatmul.msk.f32.gmra.mxu1 %vm82_vm0, %v46_v56 }
  0x73   :  { %798 = vmatmul.msk.f32.gmra.mxu2 %vm82_vm0, %v63_v57 }
  0x74   :  { %814 = vmatmul.msk.f32.gmra.mxu3 %vm82_vm0, %v79_v58 }
  0x75   :  { %766 = vmatmul.msk.f32.gmra.mxu0 %vm82_vm0, %v31_v59 }
  0x76   :  { %782 = vmatmul.msk.f32.gmra.mxu1 %vm82_vm0, %v47_v60 }
  0x7b   :  { %799 = vmatmul.msk.f32.gmra.mxu2 %vm82_vm0, %v64_v61 }
  0x7c   :  { %815 = vmatmul.msk.f32.gmra.mxu3 %vm82_vm0, %v80_v62 }
  0x7d   :  { %767 = vmatmul.msk.f32.gmra.mxu0 %vm82_vm0, %v32_v63 }
  0x7e   :  { %783 = vmatmul.msk.f32.gmra.mxu1 %vm82_vm0, %v48_v0 }
  0x82   :  { %v292_v3 = vpop.f32.mrf.mxu0 }
  0x83   :  { %v340_v4 = vpop.f32.mrf.mxu1  ;;  %v488_v5 = vmul.f32 %v1108_v1, %v292_v3 }
  0x84   :  { %v504_v6 = vmul.f32 %v1108_v1, %v340_v4 }
  0x85   :  { %v556_v7 = vadd.f32 %v1113_v2, %v488_v5 }
  0x86   :  { %v572_v8 = vadd.f32 %v1113_v2, %v504_v6  ;;  %v388_v9 = vpop.f32.mrf.mxu2 }
  0x87   :  { %v436_v10 = vpop.f32.mrf.mxu3  ;;  %v620_v11 = vmax.f32 %v556_v7, 0.0  ;;  %v520_v13 = vmul.f32 %v1108_v1, %v388_v9 }
  0x88   :  { %v636_v12 = vmax.f32 %v572_v8, 0.0  ;;  %v536_v14 = vmul.f32 %v1108_v1, %v436_v10 }
  0x89   :  { %684 = vst [vmem:[%s1439_s4] sm:$0xff] %v620_v11  ;;  %v588_v15 = vadd.f32 %v1113_v2, %v520_v13 }
  0x8a   :  { %v604_v16 = vadd.f32 %v1113_v2, %v536_v14  ;;  %700 = vst [vmem:[%s1439_s4 + $0x80] sm:$0xff] %v636_v12  ;;  %v295_v17 = vpop.f32.mrf.mxu0 }
  0x8b   :  { %v343_v18 = vpop.f32.mrf.mxu1  ;;  %v652_v19 = vmax.f32 %v588_v15, 0.0  ;;  %v489_v21 = vmul.f32 %v1108_v1, %v295_v17 }
  0x8c   :  { %v668_v20 = vmax.f32 %v604_v16, 0.0  ;;  %v505_v22 = vmul.f32 %v1108_v1, %v343_v18 }
  0x8d   :  { %716 = vst [vmem:[%s1439_s4 + $0x100] sm:$0xff] %v652_v19  ;;  %v557_v23 = vadd.f32 %v1113_v2, %v489_v21 }
  0x8e   :  { %v573_v24 = vadd.f32 %v1113_v2, %v505_v22  ;;  %732 = vst [vmem:[%s1439_s4 + $0x180] sm:$0xff] %v668_v20  ;;  %v391_v25 = vpop.f32.mrf.mxu2 }
  0x8f   :  { %v439_v26 = vpop.f32.mrf.mxu3  ;;  %v621_v27 = vmax.f32 %v557_v23, 0.0  ;;  %v521_v29 = vmul.f32 %v1108_v1, %v391_v25 }
  0x90   :  { %v637_v28 = vmax.f32 %v573_v24, 0.0  ;;  %v537_v30 = vmul.f32 %v1108_v1, %v439_v26 }
  0x91   :  { %685 = vst [vmem:[%s1439_s4 + $0x8] sm:$0xff] %v621_v27  ;;  %v589_v31 = vadd.f32 %v1113_v2, %v521_v29 }
  0x92   :  { %v605_v32 = vadd.f32 %v1113_v2, %v537_v30  ;;  %701 = vst [vmem:[%s1439_s4 + $0x88] sm:$0xff] %v637_v28  ;;  %v298_v33 = vpop.f32.mrf.mxu0 }
  0x93   :  { %v346_v34 = vpop.f32.mrf.mxu1  ;;  %v653_v35 = vmax.f32 %v589_v31, 0.0  ;;  %v490_v37 = vmul.f32 %v1108_v1, %v298_v33 }
  0x94   :  { %v669_v36 = vmax.f32 %v605_v32, 0.0  ;;  %v506_v38 = vmul.f32 %v1108_v1, %v346_v34 }
  0x95   :  { %717 = vst [vmem:[%s1439_s4 + $0x108] sm:$0xff] %v653_v35  ;;  %v558_v39 = vadd.f32 %v1113_v2, %v490_v37 }
  0x96   :  { %v574_v40 = vadd.f32 %v1113_v2, %v506_v38  ;;  %733 = vst [vmem:[%s1439_s4 + $0x188] sm:$0xff] %v669_v36  ;;  %v394_v41 = vpop.f32.mrf.mxu2 }
  0x97   :  { %v442_v42 = vpop.f32.mrf.mxu3  ;;  %v622_v43 = vmax.f32 %v558_v39, 0.0  ;;  %v522_v45 = vmul.f32 %v1108_v1, %v394_v41 }
  0x98   :  { %v638_v44 = vmax.f32 %v574_v40, 0.0  ;;  %v538_v46 = vmul.f32 %v1108_v1, %v442_v42 }
  0x99   :  { %686 = vst [vmem:[%s1439_s4 + $0x10] sm:$0xff] %v622_v43  ;;  %v590_v47 = vadd.f32 %v1113_v2, %v522_v45 }
  0x9a   :  { %v606_v48 = vadd.f32 %v1113_v2, %v538_v46  ;;  %702 = vst [vmem:[%s1439_s4 + $0x90] sm:$0xff] %v638_v44  ;;  %v301_v49 = vpop.f32.mrf.mxu0 }
  0x9b   :  { %v349_v50 = vpop.f32.mrf.mxu1  ;;  %v654_v51 = vmax.f32 %v590_v47, 0.0  ;;  %v491_v53 = vmul.f32 %v1108_v1, %v301_v49 }
  0x9c   :  { %v670_v52 = vmax.f32 %v606_v48, 0.0  ;;  %v507_v54 = vmul.f32 %v1108_v1, %v349_v50 }
  0x9d   :  { %718 = vst [vmem:[%s1439_s4 + $0x110] sm:$0xff] %v654_v51  ;;  %v559_v55 = vadd.f32 %v1113_v2, %v491_v53 }
  0x9e   :  { %v575_v56 = vadd.f32 %v1113_v2, %v507_v54  ;;  %734 = vst [vmem:[%s1439_s4 + $0x190] sm:$0xff] %v670_v52  ;;  %v397_v57 = vpop.f32.mrf.mxu2 }
  0x9f   :  { %v445_v58 = vpop.f32.mrf.mxu3  ;;  %v623_v59 = vmax.f32 %v559_v55, 0.0  ;;  %v523_v61 = vmul.f32 %v1108_v1, %v397_v57 }
  0xa0   :  { %v639_v60 = vmax.f32 %v575_v56, 0.0  ;;  %v539_v62 = vmul.f32 %v1108_v1, %v445_v58 }
  0xa1   :  { %687 = vst [vmem:[%s1439_s4 + $0x18] sm:$0xff] %v623_v59  ;;  %v591_v63 = vadd.f32 %v1113_v2, %v523_v61 }
  0xa2   :  { %v607_v0 = vadd.f32 %v1113_v2, %v539_v62  ;;  %703 = vst [vmem:[%s1439_s4 + $0x98] sm:$0xff] %v639_v60  ;;  %v304_v3 = vpop.f32.mrf.mxu0 }
  0xa3   :  { %v352_v4 = vpop.f32.mrf.mxu1  ;;  %v655_v5 = vmax.f32 %v591_v63, 0.0  ;;  %v492_v7 = vmul.f32 %v1108_v1, %v304_v3 }
  0xa4   :  { %v671_v6 = vmax.f32 %v607_v0, 0.0  ;;  %v508_v8 = vmul.f32 %v1108_v1, %v352_v4 }
  0xa5   :  { %719 = vst [vmem:[%s1439_s4 + $0x118] sm:$0xff] %v655_v5  ;;  %v560_v9 = vadd.f32 %v1113_v2, %v492_v7 }
  0xa6   :  { %v576_v10 = vadd.f32 %v1113_v2, %v508_v8  ;;  %735 = vst [vmem:[%s1439_s4 + $0x198] sm:$0xff] %v671_v6  ;;  %v400_v11 = vpop.f32.mrf.mxu2 }
  0xa7   :  { %v448_v12 = vpop.f32.mrf.mxu3  ;;  %v624_v13 = vmax.f32 %v560_v9, 0.0  ;;  %v524_v15 = vmul.f32 %v1108_v1, %v400_v11 }
  0xa8   :  { %v640_v14 = vmax.f32 %v576_v10, 0.0  ;;  %v540_v16 = vmul.f32 %v1108_v1, %v448_v12 }
  0xa9   :  { %688 = vst [vmem:[%s1439_s4 + $0x20] sm:$0xff] %v624_v13  ;;  %v592_v17 = vadd.f32 %v1113_v2, %v524_v15 }
  0xaa   :  { %v608_v18 = vadd.f32 %v1113_v2, %v540_v16  ;;  %704 = vst [vmem:[%s1439_s4 + $0xa0] sm:$0xff] %v640_v14  ;;  %v307_v19 = vpop.f32.mrf.mxu0 }
  0xab   :  { %v355_v20 = vpop.f32.mrf.mxu1  ;;  %v656_v21 = vmax.f32 %v592_v17, 0.0  ;;  %v493_v23 = vmul.f32 %v1108_v1, %v307_v19 }
  0xac   :  { %v672_v22 = vmax.f32 %v608_v18, 0.0  ;;  %v509_v24 = vmul.f32 %v1108_v1, %v355_v20 }
  0xad   :  { %720 = vst [vmem:[%s1439_s4 + $0x120] sm:$0xff] %v656_v21  ;;  %v561_v25 = vadd.f32 %v1113_v2, %v493_v23 }
  0xae   :  { %v577_v26 = vadd.f32 %v1113_v2, %v509_v24  ;;  %736 = vst [vmem:[%s1439_s4 + $0x1a0] sm:$0xff] %v672_v22  ;;  %v403_v27 = vpop.f32.mrf.mxu2 }
  0xaf   :  { %v451_v28 = vpop.f32.mrf.mxu3  ;;  %v625_v29 = vmax.f32 %v561_v25, 0.0  ;;  %v525_v31 = vmul.f32 %v1108_v1, %v403_v27 }
  0xb0   :  { %v641_v30 = vmax.f32 %v577_v26, 0.0  ;;  %v541_v32 = vmul.f32 %v1108_v1, %v451_v28 }
  0xb1   :  { %689 = vst [vmem:[%s1439_s4 + $0x28] sm:$0xff] %v625_v29  ;;  %v593_v33 = vadd.f32 %v1113_v2, %v525_v31 }
  0xb2   :  { %v609_v34 = vadd.f32 %v1113_v2, %v541_v32  ;;  %705 = vst [vmem:[%s1439_s4 + $0xa8] sm:$0xff] %v641_v30  ;;  %v310_v35 = vpop.f32.mrf.mxu0 }
  0xb3   :  { %v358_v36 = vpop.f32.mrf.mxu1  ;;  %v657_v37 = vmax.f32 %v593_v33, 0.0  ;;  %v494_v39 = vmul.f32 %v1108_v1, %v310_v35 }
  0xb4   :  { %v673_v38 = vmax.f32 %v609_v34, 0.0  ;;  %v510_v40 = vmul.f32 %v1108_v1, %v358_v36 }
  0xb5   :  { %721 = vst [vmem:[%s1439_s4 + $0x128] sm:$0xff] %v657_v37  ;;  %v562_v41 = vadd.f32 %v1113_v2, %v494_v39 }
  0xb6   :  { %v578_v42 = vadd.f32 %v1113_v2, %v510_v40  ;;  %737 = vst [vmem:[%s1439_s4 + $0x1a8] sm:$0xff] %v673_v38  ;;  %v406_v43 = vpop.f32.mrf.mxu2 }
  0xb7   :  { %v454_v44 = vpop.f32.mrf.mxu3  ;;  %v626_v45 = vmax.f32 %v562_v41, 0.0  ;;  %v526_v47 = vmul.f32 %v1108_v1, %v406_v43 }
  0xb8   :  { %v642_v46 = vmax.f32 %v578_v42, 0.0  ;;  %v542_v48 = vmul.f32 %v1108_v1, %v454_v44 }
  0xb9   :  { %690 = vst [vmem:[%s1439_s4 + $0x30] sm:$0xff] %v626_v45  ;;  %v594_v49 = vadd.f32 %v1113_v2, %v526_v47 }
  0xba   :  { %v610_v50 = vadd.f32 %v1113_v2, %v542_v48  ;;  %706 = vst [vmem:[%s1439_s4 + $0xb0] sm:$0xff] %v642_v46  ;;  %v313_v51 = vpop.f32.mrf.mxu0 }
  0xbb   :  { %v361_v52 = vpop.f32.mrf.mxu1  ;;  %v658_v53 = vmax.f32 %v594_v49, 0.0  ;;  %v495_v55 = vmul.f32 %v1108_v1, %v313_v51 }
  0xbc   :  { %v674_v54 = vmax.f32 %v610_v50, 0.0  ;;  %v511_v56 = vmul.f32 %v1108_v1, %v361_v52 }
  0xbd   :  { %722 = vst [vmem:[%s1439_s4 + $0x130] sm:$0xff] %v658_v53  ;;  %v563_v57 = vadd.f32 %v1113_v2, %v495_v55 }
  0xbe   :  { %v579_v58 = vadd.f32 %v1113_v2, %v511_v56  ;;  %738 = vst [vmem:[%s1439_s4 + $0x1b0] sm:$0xff] %v674_v54  ;;  %v409_v59 = vpop.f32.mrf.mxu2 }
  0xbf   :  { %v457_v60 = vpop.f32.mrf.mxu3  ;;  %v627_v61 = vmax.f32 %v563_v57, 0.0  ;;  %v527_v63 = vmul.f32 %v1108_v1, %v409_v59 }
  0xc0   :  { %v643_v62 = vmax.f32 %v579_v58, 0.0  ;;  %v543_v0 = vmul.f32 %v1108_v1, %v457_v60 }
  0xc1   :  { %691 = vst [vmem:[%s1439_s4 + $0x38] sm:$0xff] %v627_v61  ;;  %v595_v3 = vadd.f32 %v1113_v2, %v527_v63 }
  0xc2   :  { %v611_v4 = vadd.f32 %v1113_v2, %v543_v0  ;;  %707 = vst [vmem:[%s1439_s4 + $0xb8] sm:$0xff] %v643_v62  ;;  %v316_v5 = vpop.f32.mrf.mxu0 }
  0xc3   :  { %v364_v6 = vpop.f32.mrf.mxu1  ;;  %v659_v7 = vmax.f32 %v595_v3, 0.0  ;;  %v496_v9 = vmul.f32 %v1108_v1, %v316_v5 }
  0xc4   :  { %v675_v8 = vmax.f32 %v611_v4, 0.0  ;;  %v512_v10 = vmul.f32 %v1108_v1, %v364_v6 }
  0xc5   :  { %723 = vst [vmem:[%s1439_s4 + $0x138] sm:$0xff] %v659_v7  ;;  %v564_v11 = vadd.f32 %v1113_v2, %v496_v9 }
  0xc6   :  { %v580_v12 = vadd.f32 %v1113_v2, %v512_v10  ;;  %739 = vst [vmem:[%s1439_s4 + $0x1b8] sm:$0xff] %v675_v8  ;;  %v412_v13 = vpop.f32.mrf.mxu2 }
  0xc7   :  { %v460_v14 = vpop.f32.mrf.mxu3  ;;  %v628_v15 = vmax.f32 %v564_v11, 0.0  ;;  %v528_v17 = vmul.f32 %v1108_v1, %v412_v13 }
  0xc8   :  { %v644_v16 = vmax.f32 %v580_v12, 0.0  ;;  %v544_v18 = vmul.f32 %v1108_v1, %v460_v14 }
  0xc9   :  { %692 = vst [vmem:[%s1439_s4 + $0x40] sm:$0xff] %v628_v15  ;;  %v596_v19 = vadd.f32 %v1113_v2, %v528_v17 }
  0xca   :  { %v612_v20 = vadd.f32 %v1113_v2, %v544_v18  ;;  %708 = vst [vmem:[%s1439_s4 + $0xc0] sm:$0xff] %v644_v16  ;;  %v319_v21 = vpop.f32.mrf.mxu0 }
  0xcb   :  { %v367_v22 = vpop.f32.mrf.mxu1  ;;  %v660_v23 = vmax.f32 %v596_v19, 0.0  ;;  %v497_v25 = vmul.f32 %v1108_v1, %v319_v21 }
  0xcc   :  { %v676_v24 = vmax.f32 %v612_v20, 0.0  ;;  %v513_v26 = vmul.f32 %v1108_v1, %v367_v22 }
  0xcd   :  { %724 = vst [vmem:[%s1439_s4 + $0x140] sm:$0xff] %v660_v23  ;;  %v565_v27 = vadd.f32 %v1113_v2, %v497_v25 }
  0xce   :  { %v581_v28 = vadd.f32 %v1113_v2, %v513_v26  ;;  %740 = vst [vmem:[%s1439_s4 + $0x1c0] sm:$0xff] %v676_v24  ;;  %v415_v29 = vpop.f32.mrf.mxu2 }
  0xcf   :  { %v463_v30 = vpop.f32.mrf.mxu3  ;;  %v629_v31 = vmax.f32 %v565_v27, 0.0  ;;  %v529_v33 = vmul.f32 %v1108_v1, %v415_v29 }
  0xd0   :  { %v645_v32 = vmax.f32 %v581_v28, 0.0  ;;  %v545_v34 = vmul.f32 %v1108_v1, %v463_v30 }
  0xd1   :  { %693 = vst [vmem:[%s1439_s4 + $0x48] sm:$0xff] %v629_v31  ;;  %v597_v35 = vadd.f32 %v1113_v2, %v529_v33 }
  0xd2   :  { %v613_v36 = vadd.f32 %v1113_v2, %v545_v34  ;;  %709 = vst [vmem:[%s1439_s4 + $0xc8] sm:$0xff] %v645_v32  ;;  %v322_v37 = vpop.f32.mrf.mxu0 }
  0xd3   :  { %v370_v38 = vpop.f32.mrf.mxu1  ;;  %v661_v39 = vmax.f32 %v597_v35, 0.0  ;;  %v498_v41 = vmul.f32 %v1108_v1, %v322_v37 }
  0xd4   :  { %v677_v40 = vmax.f32 %v613_v36, 0.0  ;;  %v514_v42 = vmul.f32 %v1108_v1, %v370_v38 }
  0xd5   :  { %725 = vst [vmem:[%s1439_s4 + $0x148] sm:$0xff] %v661_v39  ;;  %v566_v43 = vadd.f32 %v1113_v2, %v498_v41 }
  0xd6   :  { %v582_v44 = vadd.f32 %v1113_v2, %v514_v42  ;;  %741 = vst [vmem:[%s1439_s4 + $0x1c8] sm:$0xff] %v677_v40  ;;  %v418_v45 = vpop.f32.mrf.mxu2 }
  0xd7   :  { %v466_v46 = vpop.f32.mrf.mxu3  ;;  %v630_v47 = vmax.f32 %v566_v43, 0.0  ;;  %v530_v49 = vmul.f32 %v1108_v1, %v418_v45 }
  0xd8   :  { %v646_v48 = vmax.f32 %v582_v44, 0.0  ;;  %v546_v50 = vmul.f32 %v1108_v1, %v466_v46 }
  0xd9   :  { %694 = vst [vmem:[%s1439_s4 + $0x50] sm:$0xff] %v630_v47  ;;  %v598_v51 = vadd.f32 %v1113_v2, %v530_v49 }
  0xda   :  { %v614_v52 = vadd.f32 %v1113_v2, %v546_v50  ;;  %710 = vst [vmem:[%s1439_s4 + $0xd0] sm:$0xff] %v646_v48  ;;  %v325_v53 = vpop.f32.mrf.mxu0 }
  0xdb   :  { %v373_v54 = vpop.f32.mrf.mxu1  ;;  %v662_v55 = vmax.f32 %v598_v51, 0.0  ;;  %v499_v57 = vmul.f32 %v1108_v1, %v325_v53 }
  0xdc   :  { %v678_v56 = vmax.f32 %v614_v52, 0.0  ;;  %v515_v58 = vmul.f32 %v1108_v1, %v373_v54 }
  0xdd   :  { %726 = vst [vmem:[%s1439_s4 + $0x150] sm:$0xff] %v662_v55  ;;  %v567_v59 = vadd.f32 %v1113_v2, %v499_v57 }
  0xde   :  { %v583_v60 = vadd.f32 %v1113_v2, %v515_v58  ;;  %742 = vst [vmem:[%s1439_s4 + $0x1d0] sm:$0xff] %v678_v56  ;;  %v421_v61 = vpop.f32.mrf.mxu2 }
  0xdf   :  { %v469_v62 = vpop.f32.mrf.mxu3  ;;  %v631_v63 = vmax.f32 %v567_v59, 0.0  ;;  %v531_v3 = vmul.f32 %v1108_v1, %v421_v61 }
  0xe0   :  { %v647_v0 = vmax.f32 %v583_v60, 0.0  ;;  %v547_v4 = vmul.f32 %v1108_v1, %v469_v62 }
  0xe1   :  { %695 = vst [vmem:[%s1439_s4 + $0x58] sm:$0xff] %v631_v63  ;;  %v599_v5 = vadd.f32 %v1113_v2, %v531_v3 }
  0xe2   :  { %v615_v6 = vadd.f32 %v1113_v2, %v547_v4  ;;  %711 = vst [vmem:[%s1439_s4 + $0xd8] sm:$0xff] %v647_v0  ;;  %v328_v7 = vpop.f32.mrf.mxu0 }
  0xe3   :  { %v376_v8 = vpop.f32.mrf.mxu1  ;;  %v663_v9 = vmax.f32 %v599_v5, 0.0  ;;  %v500_v11 = vmul.f32 %v1108_v1, %v328_v7 }
  0xe4   :  { %v679_v10 = vmax.f32 %v615_v6, 0.0  ;;  %v516_v12 = vmul.f32 %v1108_v1, %v376_v8 }
  0xe5   :  { %727 = vst [vmem:[%s1439_s4 + $0x158] sm:$0xff] %v663_v9  ;;  %v568_v13 = vadd.f32 %v1113_v2, %v500_v11 }
  0xe6   :  { %v584_v14 = vadd.f32 %v1113_v2, %v516_v12  ;;  %743 = vst [vmem:[%s1439_s4 + $0x1d8] sm:$0xff] %v679_v10  ;;  %v424_v15 = vpop.f32.mrf.mxu2 }
  0xe7   :  { %v472_v16 = vpop.f32.mrf.mxu3  ;;  %v632_v17 = vmax.f32 %v568_v13, 0.0  ;;  %v532_v19 = vmul.f32 %v1108_v1, %v424_v15 }
  0xe8   :  { %v648_v18 = vmax.f32 %v584_v14, 0.0  ;;  %v548_v20 = vmul.f32 %v1108_v1, %v472_v16 }
  0xe9   :  { %696 = vst [vmem:[%s1439_s4 + $0x60] sm:$0xff] %v632_v17  ;;  %v600_v21 = vadd.f32 %v1113_v2, %v532_v19 }
  0xea   :  { %v616_v22 = vadd.f32 %v1113_v2, %v548_v20  ;;  %712 = vst [vmem:[%s1439_s4 + $0xe0] sm:$0xff] %v648_v18  ;;  %v331_v23 = vpop.f32.mrf.mxu0 }
  0xeb   :  { %v379_v24 = vpop.f32.mrf.mxu1  ;;  %v664_v25 = vmax.f32 %v600_v21, 0.0  ;;  %v501_v27 = vmul.f32 %v1108_v1, %v331_v23 }
  0xec   :  { %v680_v26 = vmax.f32 %v616_v22, 0.0  ;;  %v517_v28 = vmul.f32 %v1108_v1, %v379_v24 }
  0xed   :  { %728 = vst [vmem:[%s1439_s4 + $0x160] sm:$0xff] %v664_v25  ;;  %v569_v29 = vadd.f32 %v1113_v2, %v501_v27 }
  0xee   :  { %v585_v30 = vadd.f32 %v1113_v2, %v517_v28  ;;  %744 = vst [vmem:[%s1439_s4 + $0x1e0] sm:$0xff] %v680_v26  ;;  %v427_v31 = vpop.f32.mrf.mxu2 }
  0xef   :  { %v475_v32 = vpop.f32.mrf.mxu3  ;;  %v633_v33 = vmax.f32 %v569_v29, 0.0  ;;  %v533_v35 = vmul.f32 %v1108_v1, %v427_v31 }
  0xf0   :  { %v649_v34 = vmax.f32 %v585_v30, 0.0  ;;  %v549_v36 = vmul.f32 %v1108_v1, %v475_v32 }
  0xf1   :  { %697 = vst [vmem:[%s1439_s4 + $0x68] sm:$0xff] %v633_v33  ;;  %v601_v37 = vadd.f32 %v1113_v2, %v533_v35 }
  0xf2   :  { %v617_v38 = vadd.f32 %v1113_v2, %v549_v36  ;;  %713 = vst [vmem:[%s1439_s4 + $0xe8] sm:$0xff] %v649_v34  ;;  %v334_v39 = vpop.f32.mrf.mxu0 }
  0xf3   :  { %v382_v40 = vpop.f32.mrf.mxu1  ;;  %v665_v41 = vmax.f32 %v601_v37, 0.0  ;;  %v502_v43 = vmul.f32 %v1108_v1, %v334_v39 }
  0xf4   :  { %v681_v42 = vmax.f32 %v617_v38, 0.0  ;;  %v518_v44 = vmul.f32 %v1108_v1, %v382_v40 }
  0xf5   :  { %729 = vst [vmem:[%s1439_s4 + $0x168] sm:$0xff] %v665_v41  ;;  %v570_v45 = vadd.f32 %v1113_v2, %v502_v43 }
  0xf6   :  { %v586_v46 = vadd.f32 %v1113_v2, %v518_v44  ;;  %745 = vst [vmem:[%s1439_s4 + $0x1e8] sm:$0xff] %v681_v42  ;;  %v430_v47 = vpop.f32.mrf.mxu2 }
  0xf7   :  { %v478_v48 = vpop.f32.mrf.mxu3  ;;  %v634_v49 = vmax.f32 %v570_v45, 0.0  ;;  %v534_v51 = vmul.f32 %v1108_v1, %v430_v47 }
  0xf8   :  { %v650_v50 = vmax.f32 %v586_v46, 0.0  ;;  %v550_v52 = vmul.f32 %v1108_v1, %v478_v48 }
  0xf9   :  { %698 = vst [vmem:[%s1439_s4 + $0x70] sm:$0xff] %v634_v49  ;;  %v602_v53 = vadd.f32 %v1113_v2, %v534_v51 }
  0xfa   :  { %v618_v54 = vadd.f32 %v1113_v2, %v550_v52  ;;  %714 = vst [vmem:[%s1439_s4 + $0xf0] sm:$0xff] %v650_v50  ;;  %v337_v55 = vpop.f32.mrf.mxu0 }
  0xfb   :  { %v385_v56 = vpop.f32.mrf.mxu1  ;;  %v666_v57 = vmax.f32 %v602_v53, 0.0  ;;  %v503_v59 = vmul.f32 %v1108_v1, %v337_v55 }
  0xfc   :  { %v682_v58 = vmax.f32 %v618_v54, 0.0  ;;  %v519_v60 = vmul.f32 %v1108_v1, %v385_v56 }
  0xfd   :  { %730 = vst [vmem:[%s1439_s4 + $0x170] sm:$0xff] %v666_v57  ;;  %v571_v61 = vadd.f32 %v1113_v2, %v503_v59 }
  0xfe   :  { %v587_v62 = vadd.f32 %v1113_v2, %v519_v60  ;;  %746 = vst [vmem:[%s1439_s4 + $0x1f0] sm:$0xff] %v682_v58  ;;  %v433_v63 = vpop.f32.mrf.mxu2 }
  0xff   :  { %v481_v0 = vpop.f32.mrf.mxu3  ;;  %v635_v3 = vmax.f32 %v571_v61, 0.0  ;;  %v535_v5 = vmul.f32 %v1108_v1, %v433_v63 }
 0x100   :  { %v651_v4 = vmax.f32 %v587_v62, 0.0  ;;  %v551_v6 = vmul.f32 %v1108_v1, %v481_v0 }
 0x101   :  { %699 = vst [vmem:[%s1439_s4 + $0x78] sm:$0xff] %v635_v3  ;;  %v603_v7 = vadd.f32 %v1113_v2, %v535_v5 }
 0x102   :  { %v619_v8 = vadd.f32 %v1113_v2, %v551_v6  ;;  %715 = vst [vmem:[%s1439_s4 + $0xf8] sm:$0xff] %v651_v4 }
 0x103   :  { %v667_v9 = vmax.f32 %v603_v7, 0.0 }
 0x104   :  { %v683_v10 = vmax.f32 %v619_v8, 0.0 }
 0x105   :  { %731 = vst [vmem:[%s1439_s4 + $0x178] sm:$0xff] %v667_v9 }
 0x106   :  { %747 = vst [vmem:[%s1439_s4 + $0x1f8] sm:$0xff] %v683_v10 }

// kernel: conv_bn_relu.2
= control target key start
LH: loop header
LB: loop body
LE: loop exit
PB: predicated region body
PF: predicated region fallthrough
CT: control target
= control target key end

     0   :  { %vm78_vm0 = vcmask 64512   ;;  %s1219_s1 = inlined_call_operand.vmem [shape: f32[8,128], index: 1, kind: input, shape index: {}]   ;;  %s1220_s0 = inlined_call_operand.vmem [shape: f32[512,8], index: 0, kind: input, shape index: {}]   ;;  %s1221_s2 = inlined_call_operand.vmem [shape: f32[1,1,128], index: 2, kind: output, shape index: {0}]   ;;  %s1222_s3 = inlined_call_operand.vmem [shape: f32[1,1,128], index: 3, kind: output, shape index: {1}]  }
   0x1   :  { %v77_v0 = vld [vmem:[%s1219_s1] sm:$0xff]  ;;  %v14_v3 = vld [vmem:[%s1220_s0 + $0x8] sm:$0xff]  ;;  %v15_v5 = vld [vmem:[%s1220_s0 + $0x10] sm:$0xff] }
   0x2   :  { %v13_v1 = vld [vmem:[%s1220_s0] sm:$0xff]  ;;  %286 = vmatpush.msra.mxu0 %v77_v0  ;;  %756 = vmatpush.msra.mxu1 %v77_v0  ;;  %v30_v4 = vld [vmem:[%s1220_s0 + $0x88] sm:$0xff]  ;;  %v31_v6 = vld [vmem:[%s1220_s0 + $0x90] sm:$0xff] }
   0x3   :  { %692 = vmatmul.msk.f32.vlgmr.msra.gmra.mxu0 %vm78_vm0, %v13_v1  ;;  %v29_v2 = vld [vmem:[%s1220_s0 + $0x80] sm:$0xff]  ;;  %757 = vmatpush.msra.mxu2 %v77_v0  ;;  %v16_v7 = vld [vmem:[%s1220_s0 + $0x18] sm:$0xff]  ;;  %v46_v12 = vld [vmem:[%s1220_s0 + $0x108] sm:$0xff] }
   0x4   :  { %708 = vmatmul.msk.f32.vlgmr.msra.gmra.mxu1 %vm78_vm0, %v29_v2  ;;  %758 = vmatpush.msra.mxu3 %v77_v0  ;;  %v32_v8 = vld [vmem:[%s1220_s0 + $0x98] sm:$0xff]  ;;  %v45_v9 = vld [vmem:[%s1220_s0 + $0x100] sm:$0xff]  ;;  %v18_v13 = vld [vmem:[%s1220_s0 + $0x28] sm:$0xff] }
   0x5   :  { %724 = vmatmul.msk.f32.vlgmr.msra.gmra.mxu2 %vm78_vm0, %v45_v9  ;;  %v17_v10 = vld [vmem:[%s1220_s0 + $0x20] sm:$0xff]  ;;  %v34_v14 = vld [vmem:[%s1220_s0 + $0xa8] sm:$0xff]  ;;  %v47_v15 = vld [vmem:[%s1220_s0 + $0x110] sm:$0xff] }
   0x6   :  { %v33_v11 = vld [vmem:[%s1220_s0 + $0xa0] sm:$0xff]  ;;  %v19_v16 = vld [vmem:[%s1220_s0 + $0x30] sm:$0xff]  ;;  %v48_v18 = vld [vmem:[%s1220_s0 + $0x118] sm:$0xff] }
   0x7   :  { %v35_v17 = vld [vmem:[%s1220_s0 + $0xb0] sm:$0xff]  ;;  %v20_v19 = vld [vmem:[%s1220_s0 + $0x38] sm:$0xff]  ;;  %v49_v21 = vld [vmem:[%s1220_s0 + $0x120] sm:$0xff] }
   0x8   :  { %v36_v20 = vld [vmem:[%s1220_s0 + $0xb8] sm:$0xff]  ;;  %v61_v22 = vld [vmem:[%s1220_s0 + $0x180] sm:$0xff]  ;;  %v50_v25 = vld [vmem:[%s1220_s0 + $0x128] sm:$0xff] }
   0x9   :  { %740 = vmatmul.msk.f32.vlgmr.msra.gmra.mxu3 %vm78_vm0, %v61_v22  ;;  %v21_v23 = vld [vmem:[%s1220_s0 + $0x40] sm:$0xff]  ;;  %v62_v26 = vld [vmem:[%s1220_s0 + $0x188] sm:$0xff]  ;;  %v51_v29 = vld [vmem:[%s1220_s0 + $0x130] sm:$0xff] }
   0xa   :  { %v37_v24 = vld [vmem:[%s1220_s0 + $0xc0] sm:$0xff]  ;;  %v22_v27 = vld [vmem:[%s1220_s0 + $0x48] sm:$0xff]  ;;  %v63_v30 = vld [vmem:[%s1220_s0 + $0x190] sm:$0xff] }
   0xb   :  { %693 = vmatmul.msk.f32.gmra.mxu0 %vm78_vm0, %v14_v3  ;;  %v38_v28 = vld [vmem:[%s1220_s0 + $0xc8] sm:$0xff]  ;;  %v23_v31 = vld [vmem:[%s1220_s0 + $0x50] sm:$0xff]  ;;  %v52_v33 = vld [vmem:[%s1220_s0 + $0x138] sm:$0xff] }
   0xc   :  { %709 = vmatmul.msk.f32.gmra.mxu1 %vm78_vm0, %v30_v4  ;;  %v39_v32 = vld [vmem:[%s1220_s0 + $0xd0] sm:$0xff]  ;;  %v64_v34 = vld [vmem:[%s1220_s0 + $0x198] sm:$0xff]  ;;  %v53_v37 = vld [vmem:[%s1220_s0 + $0x140] sm:$0xff] }
   0xd   :  { %725 = vmatmul.msk.f32.gmra.mxu2 %vm78_vm0, %v46_v12  ;;  %v24_v35 = vld [vmem:[%s1220_s0 + $0x58] sm:$0xff]  ;;  %v65_v38 = vld [vmem:[%s1220_s0 + $0x1a0] sm:$0xff]  ;;  %v54_v41 = vld [vmem:[%s1220_s0 + $0x148] sm:$0xff] }
   0xe   :  { %v40_v36 = vld [vmem:[%s1220_s0 + $0xd8] sm:$0xff]  ;;  %v25_v39 = vld [vmem:[%s1220_s0 + $0x60] sm:$0xff]  ;;  %v66_v42 = vld [vmem:[%s1220_s0 + $0x1a8] sm:$0xff] }
   0xf   :  { %v41_v40 = vld [vmem:[%s1220_s0 + $0xe0] sm:$0xff]  ;;  %v26_v43 = vld [vmem:[%s1220_s0 + $0x68] sm:$0xff]  ;;  %v55_v45 = vld [vmem:[%s1220_s0 + $0x150] sm:$0xff] }
  0x10   :  { %v42_v44 = vld [vmem:[%s1220_s0 + $0xe8] sm:$0xff]  ;;  %v67_v46 = vld [vmem:[%s1220_s0 + $0x1b0] sm:$0xff]  ;;  %v56_v49 = vld [vmem:[%s1220_s0 + $0x158] sm:$0xff] }
  0x11   :  { %741 = vmatmul.msk.f32.gmra.mxu3 %vm78_vm0, %v62_v26  ;;  %v27_v47 = vld [vmem:[%s1220_s0 + $0x70] sm:$0xff]  ;;  %v68_v50 = vld [vmem:[%s1220_s0 + $0x1b8] sm:$0xff]  ;;  %v57_v53 = vld [vmem:[%s1220_s0 + $0x160] sm:$0xff] }
  0x12   :  { %v43_v48 = vld [vmem:[%s1220_s0 + $0xf0] sm:$0xff]  ;;  %v28_v51 = vld [vmem:[%s1220_s0 + $0x78] sm:$0xff]  ;;  %v69_v54 = vld [vmem:[%s1220_s0 + $0x1c0] sm:$0xff] }
  0x13   :  { %694 = vmatmul.msk.f32.gmra.mxu0 %vm78_vm0, %v15_v5  ;;  %v44_v52 = vld [vmem:[%s1220_s0 + $0xf8] sm:$0xff]  ;;  %v58_v57 = vld [vmem:[%s1220_s0 + $0x168] sm:$0xff]  ;;  %v59_v1 = vld [vmem:[%s1220_s0 + $0x170] sm:$0xff] }
  0x14   :  { %710 = vmatmul.msk.f32.gmra.mxu1 %vm78_vm0, %v31_v6  ;;  %v70_v58 = vld [vmem:[%s1220_s0 + $0x1c8] sm:$0xff]  ;;  %v71_v2 = vld [vmem:[%s1220_s0 + $0x1d0] sm:$0xff]  ;;  %v72_v9 = vld [vmem:[%s1220_s0 + $0x1d8] sm:$0xff] }
  0x15   :  { %726 = vmatmul.msk.f32.gmra.mxu2 %vm78_vm0, %v47_v15 }
  0x19   :  { %742 = vmatmul.msk.f32.gmra.mxu3 %vm78_vm0, %v63_v30 }
  0x1b   :  { %695 = vmatmul.msk.f32.gmra.mxu0 %vm78_vm0, %v16_v7 }
  0x1c   :  { %711 = vmatmul.msk.f32.gmra.mxu1 %vm78_vm0, %v32_v8  ;;  %v60_v8 = vld [vmem:[%s1220_s0 + $0x178] sm:$0xff] }
  0x1d   :  { %727 = vmatmul.msk.f32.gmra.mxu2 %vm78_vm0, %v48_v18 }
  0x21   :  { %743 = vmatmul.msk.f32.gmra.mxu3 %vm78_vm0, %v64_v34 }
  0x23   :  { %696 = vmatmul.msk.f32.gmra.mxu0 %vm78_vm0, %v17_v10 }
  0x24   :  { %712 = vmatmul.msk.f32.gmra.mxu1 %vm78_vm0, %v33_v11 }
  0x25   :  { %728 = vmatmul.msk.f32.gmra.mxu2 %vm78_vm0, %v49_v21  ;;  %v74_v21 = vld [vmem:[%s1220_s0 + $0x1e8] sm:$0xff] }
  0x29   :  { %744 = vmatmul.msk.f32.gmra.mxu3 %vm78_vm0, %v65_v38 }
  0x2b   :  { %697 = vmatmul.msk.f32.gmra.mxu0 %vm78_vm0, %v18_v13 }
  0x2c   :  { %713 = vmatmul.msk.f32.gmra.mxu1 %vm78_vm0, %v34_v14  ;;  %v73_v14 = vld [vmem:[%s1220_s0 + $0x1e0] sm:$0xff] }
  0x2d   :  { %729 = vmatmul.msk.f32.gmra.mxu2 %vm78_vm0, %v50_v25  ;;  %v75_v25 = vld [vmem:[%s1220_s0 + $0x1f0] sm:$0xff] }
  0x31   :  { %745 = vmatmul.msk.f32.gmra.mxu3 %vm78_vm0, %v66_v42 }
  0x33   :  { %698 = vmatmul.msk.f32.gmra.mxu0 %vm78_vm0, %v19_v16 }
  0x34   :  { %714 = vmatmul.msk.f32.gmra.mxu1 %vm78_vm0, %v35_v17 }
  0x35   :  { %730 = vmatmul.msk.f32.gmra.mxu2 %vm78_vm0, %v51_v29  ;;  %v76_v29 = vld [vmem:[%s1220_s0 + $0x1f8] sm:$0xff] }
  0x39   :  { %746 = vmatmul.msk.f32.gmra.mxu3 %vm78_vm0, %v67_v46 }
  0x3b   :  { %699 = vmatmul.msk.f32.gmra.mxu0 %vm78_vm0, %v20_v19 }
  0x3c   :  { %715 = vmatmul.msk.f32.gmra.mxu1 %vm78_vm0, %v36_v20 }
  0x3d   :  { %731 = vmatmul.msk.f32.gmra.mxu2 %vm78_vm0, %v52_v33 }
  0x41   :  { %747 = vmatmul.msk.f32.gmra.mxu3 %vm78_vm0, %v68_v50 }
  0x43   :  { %700 = vmatmul.msk.f32.gmra.mxu0 %vm78_vm0, %v21_v23 }
  0x44   :  { %716 = vmatmul.msk.f32.gmra.mxu1 %vm78_vm0, %v37_v24 }
  0x45   :  { %732 = vmatmul.msk.f32.gmra.mxu2 %vm78_vm0, %v53_v37 }
  0x49   :  { %748 = vmatmul.msk.f32.gmra.mxu3 %vm78_vm0, %v69_v54 }
  0x4b   :  { %701 = vmatmul.msk.f32.gmra.mxu0 %vm78_vm0, %v22_v27 }
  0x4c   :  { %717 = vmatmul.msk.f32.gmra.mxu1 %vm78_vm0, %v38_v28 }
  0x4d   :  { %733 = vmatmul.msk.f32.gmra.mxu2 %vm78_vm0, %v54_v41 }
  0x51   :  { %749 = vmatmul.msk.f32.gmra.mxu3 %vm78_vm0, %v70_v58 }
  0x53   :  { %702 = vmatmul.msk.f32.gmra.mxu0 %vm78_vm0, %v23_v31 }
  0x54   :  { %718 = vmatmul.msk.f32.gmra.mxu1 %vm78_vm0, %v39_v32 }
  0x55   :  { %734 = vmatmul.msk.f32.gmra.mxu2 %vm78_vm0, %v55_v45 }
  0x59   :  { %750 = vmatmul.msk.f32.gmra.mxu3 %vm78_vm0, %v71_v2 }
  0x5b   :  { %703 = vmatmul.msk.f32.gmra.mxu0 %vm78_vm0, %v24_v35 }
  0x5c   :  { %719 = vmatmul.msk.f32.gmra.mxu1 %vm78_vm0, %v40_v36 }
  0x5d   :  { %735 = vmatmul.msk.f32.gmra.mxu2 %vm78_vm0, %v56_v49 }
  0x61   :  { %751 = vmatmul.msk.f32.gmra.mxu3 %vm78_vm0, %v72_v9 }
  0x63   :  { %704 = vmatmul.msk.f32.gmra.mxu0 %vm78_vm0, %v25_v39 }
  0x64   :  { %720 = vmatmul.msk.f32.gmra.mxu1 %vm78_vm0, %v41_v40 }
  0x65   :  { %736 = vmatmul.msk.f32.gmra.mxu2 %vm78_vm0, %v57_v53 }
  0x69   :  { %752 = vmatmul.msk.f32.gmra.mxu3 %vm78_vm0, %v73_v14 }
  0x6b   :  { %705 = vmatmul.msk.f32.gmra.mxu0 %vm78_vm0, %v26_v43 }
  0x6c   :  { %721 = vmatmul.msk.f32.gmra.mxu1 %vm78_vm0, %v42_v44 }
  0x6d   :  { %737 = vmatmul.msk.f32.gmra.mxu2 %vm78_vm0, %v58_v57 }
  0x71   :  { %753 = vmatmul.msk.f32.gmra.mxu3 %vm78_vm0, %v74_v21 }
  0x73   :  { %706 = vmatmul.msk.f32.gmra.mxu0 %vm78_vm0, %v27_v47 }
  0x74   :  { %722 = vmatmul.msk.f32.gmra.mxu1 %vm78_vm0, %v43_v48 }
  0x75   :  { %738 = vmatmul.msk.f32.gmra.mxu2 %vm78_vm0, %v59_v1 }
  0x79   :  { %754 = vmatmul.msk.f32.gmra.mxu3 %vm78_vm0, %v75_v25 }
  0x7b   :  { %707 = vmatmul.msk.f32.gmra.mxu0 %vm78_vm0, %v28_v51 }
  0x7c   :  { %723 = vmatmul.msk.f32.gmra.mxu1 %vm78_vm0, %v44_v52 }
  0x7d   :  { %739 = vmatmul.msk.f32.gmra.mxu2 %vm78_vm0, %v60_v8 }
  0x80   :  { %v288_v55 = vpop.f32.mrf.mxu0 }
  0x81   :  { %v998_v56 = vpop.f32.mrf.mxu1  ;;  %v550_v60 = vmul.f32 %v288_v55, %v288_v55  ;;  %755 = vmatmul.msk.f32.gmra.mxu3 %vm78_vm0, %v76_v29 }
  0x88   :  { %v291_v59 = vpop.f32.mrf.mxu0  ;;  %v1034_v17 = vpop.f32.mrf.mxu2 }
  0x89   :  { %v480_v61 = vadd.f32 %v291_v59, %v288_v55  ;;  %v551_v62 = vmul.f32 %v291_v59, %v291_v59  ;;  %v1008_v63 = vpop.f32.mrf.mxu1 }
  0x8b   :  { %v614_v0 = vadd.f32 %v551_v62, %v550_v60 }
  0x8c   :  { %v1060_v34 = vpop.f32.mrf.mxu3 }
  0x90   :  { %v294_v3 = vpop.f32.mrf.mxu0  ;;  %v1042_v24 = vpop.f32.mrf.mxu2 }
  0x91   :  { %v481_v4 = vadd.f32 %v480_v61, %v294_v3  ;;  %v552_v5 = vmul.f32 %v294_v3, %v294_v3  ;;  %v1018_v6 = vpop.f32.mrf.mxu1 }
  0x93   :  { %v615_v7 = vadd.f32 %v614_v0, %v552_v5 }
  0x94   :  { %v1066_v38 = vpop.f32.mrf.mxu3 }
  0x98   :  { %v297_v10 = vpop.f32.mrf.mxu0  ;;  %v1050_v28 = vpop.f32.mrf.mxu2 }
  0x99   :  { %v482_v11 = vadd.f32 %v481_v4, %v297_v10  ;;  %v553_v12 = vmul.f32 %v297_v10, %v297_v10  ;;  %v1031_v15 = vpop.f32.mrf.mxu1 }
  0x9b   :  { %v616_v13 = vadd.f32 %v615_v7, %v553_v12 }
  0x9c   :  { %v1072_v42 = vpop.f32.mrf.mxu3 }
  0xa0   :  { %v300_v16 = vpop.f32.mrf.mxu0  ;;  %v1058_v32 = vpop.f32.mrf.mxu2 }
  0xa1   :  { %v483_v18 = vadd.f32 %v482_v11, %v300_v16  ;;  %v554_v19 = vmul.f32 %v300_v16, %v300_v16  ;;  %v1040_v22 = vpop.f32.mrf.mxu1 }
  0xa3   :  { %v617_v20 = vadd.f32 %v616_v13, %v554_v19 }
  0xa4   :  { %v1078_v46 = vpop.f32.mrf.mxu3 }
  0xa8   :  { %v303_v23 = vpop.f32.mrf.mxu0  ;;  %v1064_v36 = vpop.f32.mrf.mxu2 }
  0xa9   :  { %v1048_v27 = vpop.f32.mrf.mxu1  ;;  %v555_v49 = vmul.f32 %v303_v23, %v303_v23  ;;  %v484_v51 = vadd.f32 %v483_v18, %v303_v23 }
  0xab   :  { %v618_v54 = vadd.f32 %v617_v20, %v555_v49 }
  0xac   :  { %v1084_v53 = vpop.f32.mrf.mxu3 }
  0xb0   :  { %v306_v26 = vpop.f32.mrf.mxu0  ;;  %v1070_v41 = vpop.f32.mrf.mxu2 }
  0xb1   :  { %v1056_v31 = vpop.f32.mrf.mxu1  ;;  %v556_v52 = vmul.f32 %v306_v26, %v306_v26  ;;  %v485_v55 = vadd.f32 %v484_v51, %v306_v26 }
  0xb3   :  { %v619_v59 = vadd.f32 %v618_v54, %v556_v52 }
  0xb4   :  { %v1090_v12 = vpop.f32.mrf.mxu3 }
  0xb8   :  { %v309_v30 = vpop.f32.mrf.mxu0  ;;  %v1076_v45 = vpop.f32.mrf.mxu2 }
  0xb9   :  { %v1062_v35 = vpop.f32.mrf.mxu1  ;;  %v557_v57 = vmul.f32 %v309_v30, %v309_v30  ;;  %v486_v60 = vadd.f32 %v485_v55, %v309_v30  ;;  %v567_v55 = vmul.f32 %v1008_v63, %v1008_v63 }
  0xbb   :  { %v620_v62 = vadd.f32 %v619_v59, %v557_v57  ;;  %v568_v59 = vmul.f32 %v1018_v6, %v1018_v6 }
  0xbc   :  { %v1094_v52 = vpop.f32.mrf.mxu3 }
  0xc0   :  { %v312_v33 = vpop.f32.mrf.mxu0  ;;  %v1082_v50 = vpop.f32.mrf.mxu2 }
  0xc1   :  { %v1068_v39 = vpop.f32.mrf.mxu1  ;;  %v558_v61 = vmul.f32 %v312_v33, %v312_v33  ;;  %v487_v0 = vadd.f32 %v486_v60, %v312_v33 }
  0xc3   :  { %v621_v3 = vadd.f32 %v620_v62, %v558_v61 }
  0xc8   :  { %v315_v37 = vpop.f32.mrf.mxu0  ;;  %v1088_v7 = vpop.f32.mrf.mxu2 }
  0xc9   :  { %v1074_v44 = vpop.f32.mrf.mxu1  ;;  %v559_v1 = vmul.f32 %v315_v37, %v315_v37  ;;  %v488_v4 = vadd.f32 %v487_v0, %v315_v37  ;;  %v569_v0 = vmul.f32 %v1031_v15, %v1031_v15 }
  0xcb   :  { %v622_v8 = vadd.f32 %v621_v3, %v559_v1 }
  0xd0   :  { %v318_v40 = vpop.f32.mrf.mxu0  ;;  %v1092_v37 = vpop.f32.mrf.mxu2 }
  0xd1   :  { %v1080_v48 = vpop.f32.mrf.mxu1  ;;  %v560_v5 = vmul.f32 %v318_v40, %v318_v40  ;;  %v489_v9 = vadd.f32 %v488_v4, %v318_v40  ;;  %v570_v4 = vmul.f32 %v1040_v22, %v1040_v22 }
  0xd3   :  { %v623_v13 = vadd.f32 %v622_v8, %v560_v5  ;;  %v1113_v8 = vpop.f32.mrf.mxu3 }
  0xd8   :  { %v321_v43 = vpop.f32.mrf.mxu0  ;;  %v1108_v3 = vpop.f32.mrf.mxu2 }
  0xd9   :  { %v1086_v2 = vpop.f32.mrf.mxu1  ;;  %v561_v10 = vmul.f32 %v321_v43, %v321_v43  ;;  %v490_v14 = vadd.f32 %v489_v9, %v321_v43  ;;  %v566_v43 = vmul.f32 %v998_v56, %v998_v56 }
  0xdb   :  { %v624_v18 = vadd.f32 %v623_v13, %v561_v10 }
  0xe0   :  { %v324_v47 = vpop.f32.mrf.mxu0 }
  0xe1   :  { %v562_v16 = vmul.f32 %v324_v47, %v324_v47  ;;  %v491_v19 = vadd.f32 %v490_v14, %v324_v47  ;;  %v372_v26 = vpop.f32.mrf.mxu1  ;;  %v573_v14 = vmul.f32 %v1062_v35, %v1062_v35 }
  0xe3   :  { %v625_v21 = vadd.f32 %v624_v18, %v562_v16 }
  0xe8   :  { %v327_v58 = vpop.f32.mrf.mxu0 }
  0xe9   :  { %v563_v20 = vmul.f32 %v327_v58, %v327_v58  ;;  %v492_v23 = vadd.f32 %v491_v19, %v327_v58  ;;  %v375_v62 = vpop.f32.mrf.mxu1  ;;  %v574_v19 = vmul.f32 %v1068_v39, %v1068_v39 }
  0xeb   :  { %v626_v29 = vadd.f32 %v625_v21, %v563_v20  ;;  %v1127_v21 = vpop.f32.mrf.mxu2 }
  0xf0   :  { %v330_v11 = vpop.f32.mrf.mxu0 }
  0xf1   :  { %v564_v25 = vmul.f32 %v330_v11, %v330_v11  ;;  %v493_v30 = vadd.f32 %v492_v23, %v330_v11  ;;  %v378_v18 = vpop.f32.mrf.mxu1  ;;  %v575_v23 = vmul.f32 %v1074_v44, %v1074_v44 }
  0xf3   :  { %v627_v40 = vadd.f32 %v626_v29, %v564_v25  ;;  %v1132_v29 = vpop.f32.mrf.mxu3 }
  0xf8   :  { %v333_v33 = vpop.f32.mrf.mxu0 }
  0xf9   :  { %v494_v49 = vadd.f32 %v493_v30, %v333_v33  ;;  %v565_v51 = vmul.f32 %v333_v33, %v333_v33 }
  0xfb   :  { %v495_v47 = vadd.f32 %v494_v49, %v998_v56  ;;  %v628_v54 = vadd.f32 %v627_v40, %v565_v51 }
  0xfd   :  { %v496_v57 = vadd.f32 %v495_v47, %v1008_v63  ;;  %v629_v58 = vadd.f32 %v628_v54, %v566_v43  ;;  %v578_v47 = vmul.f32 %v372_v26, %v372_v26  ;;  %v381_v54 = vpop.f32.mrf.mxu1 }
  0xff   :  { %v497_v60 = vadd.f32 %v496_v57, %v1018_v6  ;;  %v630_v61 = vadd.f32 %v629_v58, %v567_v55  ;;  %v571_v6 = vmul.f32 %v1048_v27, %v1048_v27  ;;  %v579_v57 = vmul.f32 %v375_v62, %v375_v62  ;;  %v420_v58 = vpop.f32.mrf.mxu2 }
 0x101   :  { %v498_v1 = vadd.f32 %v497_v60, %v1031_v15  ;;  %v631_v56 = vadd.f32 %v630_v61, %v568_v59  ;;  %v572_v15 = vmul.f32 %v1056_v31, %v1056_v31  ;;  %v580_v61 = vmul.f32 %v378_v18, %v378_v18 }
 0x103   :  { %v499_v63 = vadd.f32 %v498_v1, %v1040_v22  ;;  %v632_v5 = vadd.f32 %v631_v56, %v569_v0  ;;  %v581_v0 = vmul.f32 %v381_v54, %v381_v54 }
 0x105   :  { %v500_v9 = vadd.f32 %v499_v63, %v1048_v27  ;;  %v633_v10 = vadd.f32 %v632_v5, %v570_v4 }
 0x107   :  { %v634_v11 = vadd.f32 %v633_v10, %v571_v6  ;;  %v501_v13 = vadd.f32 %v500_v9, %v1056_v31  ;;  %v584_v6 = vmul.f32 %v1050_v28, %v1050_v28 }
 0x109   :  { %v502_v22 = vadd.f32 %v501_v13, %v1062_v35  ;;  %v635_v16 = vadd.f32 %v634_v11, %v572_v15  ;;  %v576_v35 = vmul.f32 %v1080_v48, %v1080_v48  ;;  %v423_v15 = vpop.f32.mrf.mxu2  ;;  %v585_v11 = vmul.f32 %v1058_v32, %v1058_v32 }
 0x10b   :  { %v503_v20 = vadd.f32 %v502_v22, %v1068_v39  ;;  %v636_v27 = vadd.f32 %v635_v16, %v573_v14  ;;  %v577_v39 = vmul.f32 %v1086_v2, %v1086_v2  ;;  %v586_v22 = vmul.f32 %v1064_v36, %v1064_v36 }
 0x10d   :  { %v504_v31 = vadd.f32 %v503_v20, %v1074_v44  ;;  %v637_v25 = vadd.f32 %v636_v27, %v574_v19  ;;  %v588_v20 = vmul.f32 %v1076_v45, %v1076_v45 }
 0x10f   :  { %v505_v30 = vadd.f32 %v504_v31, %v1080_v48  ;;  %v638_v33 = vadd.f32 %v637_v25, %v575_v23  ;;  %v1140_v48 = vpop.f32.mrf.mxu3  ;;  %v589_v23 = vmul.f32 %v1082_v50, %v1082_v50 }
 0x111   :  { %v506_v40 = vadd.f32 %v505_v30, %v1086_v2  ;;  %v639_v49 = vadd.f32 %v638_v33, %v576_v35  ;;  %v582_v2 = vmul.f32 %v1034_v17, %v1034_v17  ;;  %v590_v35 = vmul.f32 %v1088_v7, %v1088_v7 }
 0x113   :  { %v640_v51 = vadd.f32 %v639_v49, %v577_v39  ;;  %v507_v43 = vadd.f32 %v506_v40, %v372_v26  ;;  %v583_v26 = vmul.f32 %v1042_v24, %v1042_v24  ;;  %v591_v40 = vmul.f32 %v1092_v37, %v1092_v37 }
 0x114   :  { %v592_v49 = vmul.f32 %v1108_v3, %v1108_v3 }
 0x115   :  { %v641_v44 = vadd.f32 %v640_v51, %v578_v47  ;;  %v508_v55 = vadd.f32 %v507_v43, %v375_v62  ;;  %v593_v47 = vmul.f32 %v1127_v21, %v1127_v21 }
 0x117   :  { %v642_v59 = vadd.f32 %v641_v44, %v579_v57  ;;  %v509_v60 = vadd.f32 %v508_v55, %v378_v18  ;;  %v1154_v14 = vpop.f32.mrf.mxu3  ;;  %v587_v18 = vmul.f32 %v1070_v41, %v1070_v41  ;;  %v594_v55 = vmul.f32 %v420_v58, %v420_v58 }
 0x119   :  { %v643_v1 = vadd.f32 %v642_v59, %v580_v61  ;;  %v510_v56 = vadd.f32 %v509_v60, %v381_v54 }
 0x11b   :  { %v511_v4 = vadd.f32 %v510_v56, %v1034_v17  ;;  %v644_v63 = vadd.f32 %v643_v1, %v581_v0 }
 0x11d   :  { %v512_v62 = vadd.f32 %v511_v4, %v1042_v24  ;;  %v645_v5 = vadd.f32 %v644_v63, %v582_v2  ;;  %v598_v63 = vmul.f32 %v1060_v34, %v1060_v34 }
 0x11f   :  { %v513_v9 = vadd.f32 %v512_v62, %v1050_v28  ;;  %v646_v10 = vadd.f32 %v645_v5, %v583_v26  ;;  %v465_v33 = vpop.f32.mrf.mxu3 }
 0x121   :  { %v514_v13 = vadd.f32 %v513_v9, %v1058_v32  ;;  %v647_v17 = vadd.f32 %v646_v10, %v584_v6  ;;  %v600_v6 = vmul.f32 %v1072_v42, %v1072_v42 }
 0x123   :  { %v515_v24 = vadd.f32 %v514_v13, %v1064_v36  ;;  %v648_v16 = vadd.f32 %v647_v17, %v585_v11  ;;  %v426_v36 = vpop.f32.mrf.mxu2  ;;  %v601_v11 = vmul.f32 %v1078_v46, %v1078_v46  ;;  %v602_v17 = vmul.f32 %v1084_v53, %v1084_v53 }
 0x124   :  { %v596_v56 = vmul.f32 %v426_v36, %v426_v36 }
 0x125   :  { %v516_v28 = vadd.f32 %v515_v24, %v1070_v41  ;;  %v649_v19 = vadd.f32 %v648_v16, %v586_v22  ;;  %v603_v24 = vmul.f32 %v1090_v12, %v1090_v12 }
 0x127   :  { %v650_v27 = vadd.f32 %v649_v19, %v587_v18  ;;  %v517_v32 = vadd.f32 %v516_v28, %v1076_v45  ;;  %v468_v61 = vpop.f32.mrf.mxu3  ;;  %v604_v18 = vmul.f32 %v1094_v52, %v1094_v52 }
 0x129   :  { %v518_v31 = vadd.f32 %v517_v32, %v1082_v50  ;;  %v651_v25 = vadd.f32 %v650_v27, %v588_v20  ;;  %v606_v32 = vmul.f32 %v1132_v29, %v1132_v29 }
 0x12b   :  { %v519_v30 = vadd.f32 %v518_v31, %v1088_v7  ;;  %v652_v41 = vadd.f32 %v651_v25, %v589_v23  ;;  %v429_v57 = vpop.f32.mrf.mxu2  ;;  %v607_v31 = vmul.f32 %v1140_v48, %v1140_v48 }
 0x12c   :  { %v597_v2 = vmul.f32 %v429_v57, %v429_v57 }
 0x12d   :  { %v520_v39 = vadd.f32 %v519_v30, %v1092_v37  ;;  %v653_v45 = vadd.f32 %v652_v41, %v590_v35  ;;  %v595_v37 = vmul.f32 %v423_v15, %v423_v15  ;;  %v609_v41 = vmul.f32 %v465_v33, %v465_v33 }
 0x12f   :  { %v521_v50 = vadd.f32 %v520_v39, %v1108_v3  ;;  %v654_v51 = vadd.f32 %v653_v45, %v591_v40 }
 0x131   :  { %v522_v43 = vadd.f32 %v521_v50, %v1127_v21  ;;  %v655_v7 = vadd.f32 %v654_v51, %v592_v49  ;;  %v610_v49 = vmul.f32 %v468_v61, %v468_v61 }
 0x133   :  { %v656_v54 = vadd.f32 %v655_v7, %v593_v47  ;;  %v523_v44 = vadd.f32 %v522_v43, %v420_v58  ;;  %v599_v58 = vmul.f32 %v1066_v38, %v1066_v38 }
 0x135   :  { %v657_v59 = vadd.f32 %v656_v54, %v594_v55  ;;  %v524_v60 = vadd.f32 %v523_v44, %v423_v15  ;;  %v471_v15 = vpop.f32.mrf.mxu3 }
 0x136   :  { %v611_v43 = vmul.f32 %v471_v15, %v471_v15 }
 0x137   :  { %v658_v0 = vadd.f32 %v657_v59, %v595_v37  ;;  %v525_v1 = vadd.f32 %v524_v60, %v426_v36 }
 0x139   :  { %v659_v3 = vadd.f32 %v658_v0, %v596_v56  ;;  %v526_v4 = vadd.f32 %v525_v1, %v429_v57 }
 0x13b   :  { %v527_v21 = vadd.f32 %v526_v4, %v1060_v34  ;;  %v660_v26 = vadd.f32 %v659_v3, %v597_v2 }
 0x13d   :  { %v528_v62 = vadd.f32 %v527_v21, %v1066_v38  ;;  %v661_v5 = vadd.f32 %v660_v26, %v598_v63 }
 0x13f   :  { %v529_v9 = vadd.f32 %v528_v62, %v1072_v42  ;;  %v662_v10 = vadd.f32 %v661_v5, %v599_v58 }
 0x141   :  { %v530_v13 = vadd.f32 %v529_v9, %v1078_v46  ;;  %v663_v34 = vadd.f32 %v662_v10, %v600_v6  ;;  %v605_v46 = vmul.f32 %v1113_v8, %v1113_v8 }
 0x143   :  { %v531_v22 = vadd.f32 %v530_v13, %v1084_v53  ;;  %v664_v38 = vadd.f32 %v663_v34, %v601_v11  ;;  %v474_v53 = vpop.f32.mrf.mxu3 }
 0x145   :  { %v532_v16 = vadd.f32 %v531_v22, %v1090_v12  ;;  %v665_v42 = vadd.f32 %v664_v38, %v602_v17 }
 0x147   :  { %v666_v28 = vadd.f32 %v665_v42, %v603_v24  ;;  %v533_v19 = vadd.f32 %v532_v16, %v1094_v52  ;;  %v608_v52 = vmul.f32 %v1154_v14, %v1154_v14 }
 0x149   :  { %v534_v20 = vadd.f32 %v533_v19, %v1113_v8  ;;  %v667_v27 = vadd.f32 %v666_v28, %v604_v18 }
 0x14b   :  { %v535_v23 = vadd.f32 %v534_v20, %v1132_v29  ;;  %v668_v12 = vadd.f32 %v667_v27, %v605_v46  ;;  %v477_v29 = vpop.f32.mrf.mxu3 }
 0x14c   :  { %v613_v54 = vmul.f32 %v477_v29, %v477_v29 }
 0x14d   :  { %v536_v25 = vadd.f32 %v535_v23, %v1140_v48  ;;  %v669_v36 = vadd.f32 %v668_v12, %v606_v32  ;;  %v612_v48 = vmul.f32 %v474_v53, %v474_v53 }
 0x14f   :  { %v537_v35 = vadd.f32 %v536_v25, %v1154_v14  ;;  %v670_v8 = vadd.f32 %v669_v36, %v607_v31 }
 0x151   :  { %v538_v30 = vadd.f32 %v537_v35, %v465_v33  ;;  %v671_v40 = vadd.f32 %v670_v8, %v608_v52 }
 0x153   :  { %v672_v39 = vadd.f32 %v671_v40, %v609_v41  ;;  %v539_v45 = vadd.f32 %v538_v30, %v468_v61 }
 0x155   :  { %v673_v50 = vadd.f32 %v672_v39, %v610_v49  ;;  %v540_v51 = vadd.f32 %v539_v45, %v471_v15 }
 0x157   :  { %v674_v47 = vadd.f32 %v673_v50, %v611_v43  ;;  %v541_v7 = vadd.f32 %v540_v51, %v474_v53 }
 0x159   :  { %v675_v44 = vadd.f32 %v674_v47, %v612_v48  ;;  %v542_v55 = vadd.f32 %v541_v7, %v477_v29 }
 0x15b   :  { %v543_v57 = vrot.slane %v542_v55, 4  ;;  %v676_v59 = vadd.f32 %v675_v44, %v613_v54 }
 0x15d   :  { %v544_v14 = vadd.f32 %v543_v57, %v542_v55  ;;  %v677_v60 = vrot.slane %v676_v59, 4 }
 0x15f   :  { %v545_v37 = vrot.slane %v544_v14, 2  ;;  %v678_v33 = vadd.f32 %v677_v60, %v676_v59 }
 0x161   :  { %v546_v0 = vadd.f32 %v545_v37, %v544_v14  ;;  %v679_v1 = vrot.slane %v678_v33, 2 }
 0x163   :  { %v547_v56 = vrot.slane %v546_v0, 1  ;;  %v680_v61 = vadd.f32 %v679_v1, %v678_v33 }
 0x165   :  { %v548_v2 = vadd.f32 %v547_v56, %v546_v0  ;;  %v681_v3 = vrot.slane %v680_v61, 1 }
 0x167   :  { %549 = vst [vmem:[%s1221_s2] sm:$0x1] %v548_v2  ;;  %v682_v4 = vadd.f32 %v681_v3, %v680_v61 }
 0x169   :  { %683 = vst [vmem:[%s1222_s3] sm:$0x1] %v682_v4 }

</bundles_post_ra>
